<compile_context>
chip_gen: v6e
topology: v6e:2x2x1
jax: 0.10.0
libtpu: 0.0.40
codegen_flags: <defaults>
</compile_context>

<pallas_src>
import numpy as np
import jax
import jax.numpy as jnp
from jax import lax
from jax.experimental import pallas as pl
from jax.experimental.pallas import tpu as pltpu
from jax.scipy.linalg import block_diag

F_COV, F_CLAIM, F_HOS, F_VAC = 1, 20, 4, 17
DYN_DIMS = F_COV + F_CLAIM + F_HOS + F_VAC       # 42 (hard-coded slices in the module)
POS_DIMS = F_COV + F_CLAIM + F_HOS               # 25 (the vac block is negated)


# ----------------------------------------------------------------------------- kernel
def _fused_kernel(x_ref,
                  w1b_ref, b1b_ref, w2b_ref, b2b_ref,
                  xs_ref, wblk_ref, a1_ref, a2t_ref, geo_ref,
                  wih_ref, whh_ref, blstm_ref,
                  lw_ref, lb_ref, l2w_ref, l2b_ref,
                  y_ref, dist_ref, tw_ref, hc_ref):
    f32 = jnp.float32
    TN, F = x_ref.shape
    N = dist_ref.shape[0]
    T = TN // N
    R = whh_ref.shape[0]

    # -------- gating MLPs fused as one block-diagonal two-layer MLP --------
    x = x_ref[...]                                                   # [T*N, F] time-major
    h1 = jnp.dot(x, w1b_ref[...], preferred_element_type=f32) + b1b_ref[...]
    h1 = jnp.where(h1 > 0, h1, 0.01 * h1)                            # LeakyReLU(0.01)
    col = lax.broadcasted_iota(jnp.int32, (1, F), 1)
    sgn = jnp.where(col < POS_DIMS, 1.0, -1.0).astype(f32)           # +1 | +1 | +1 | -1
    tw = sgn * jax.nn.sigmoid(
        jnp.dot(h1, w2b_ref[...], preferred_element_type=f32) + b2b_ref[...])
    tw_ref[...] = tw
    gated = tw * x                                                   # LSTM input, (t,n) rows

    # -------- static graph "distance" (pop|demo|eco fused, geo pre-folded) --------
    # d_k[i,j] = sigmoid(h_k[i] @ a_k1 + h_k[j] @ a_k2) = sigmoid(u[i,k] + v[k,j])
    hstat = jnp.dot(xs_ref[...], wblk_ref[...], preferred_element_type=f32)   # [N, P]
    u = jnp.dot(hstat, a1_ref[...], preferred_element_type=f32)               # [N, 3]
    v = lax.dot_general(a2t_ref[...], hstat, (((1,), (1,)), ((), ())),
                        preferred_element_type=f32)                           # [3, N]
    d = jax.nn.sigmoid(geo_ref[...])                                          # geo term
    for k in range(v.shape[0]):
        d = d + jax.nn.sigmoid(u[:, k:k + 1] + v[k:k + 1, :])
    m = jnp.max(d, axis=-1, keepdims=True)
    e = jnp.exp(d - m)
    dist_ref[...] = e / jnp.sum(e, axis=-1, keepdims=True)

    # -------- LSTM: hoisted fused input projection, one fused recurrent matmul/step --------
    xw = jnp.dot(gated, wih_ref[...], preferred_element_type=f32) + blstm_ref[...]  # [T*N, 4R]
    whh = whh_ref[...]                                                               # [R, 4R]
    h = jnp.zeros((N, R), f32)
    c = jnp.zeros((N, R), f32)
    hs = []
    for t in range(T):                                   # static unroll (T small)
        g = xw[t * N:(t + 1) * N, :] + jnp.dot(h, whh, preferred_element_type=f32)  # [N, 4R]
        ig = jax.nn.sigmoid(g[:, :R])
        fg = jax.nn.sigmoid(g[:, R:2 * R])
        gg = jnp.tanh(g[:, 2 * R:3 * R])
        og = jax.nn.sigmoid(g[:, 3 * R:])
        c = fg * c + ig * gg
        h = og * jnp.tanh(c)
        hs.append(h)
    hc_ref[:, :R] = h
    hc_ref[:, R:] = c

    # -------- output head, batched over all timesteps --------
    # h_att = h * (1 + sum_j dist[i,j]) = 2*h (softmax rows sum to 1); the factor
    # 2 is folded into lw in prepare_params, so y no longer depends on dist.
    H = jnp.concatenate(hs, axis=0)                                            # [T*N, R]
    y1 = jnp.dot(H, lw_ref[...], preferred_element_type=f32) + lb_ref[...]
    y1 = jnp.where(y1 > 0, y1, 0.01 * y1)                                      # LeakyReLU
    y_ref[...] = jnp.dot(y1, l2w_ref[...], preferred_element_type=f32) + l2b_ref[...]


_VMEM = pl.BlockSpec(memory_space=pltpu.MemorySpace.VMEM)


# ----------------------------------------------------------------------------- prep (one-time)
def prepare_params(params, static):
    """One-time packing of parameters + static graph inputs into kernel operands."""
    pop, demo, eco, geo = static
    R = params["lstm_whh"].shape[0]
    names = ("cov", "claim", "hos", "vac")

    # Block-diagonal fused gating weights.
    w1b = block_diag(*[params[nm + "_w1"] for nm in names])          # [42, 4R]
    w2b = block_diag(*[params[nm + "_w2"] for nm in names])          # [4R, 42]
    b1b = jnp.concatenate([params[nm + "_b1"] for nm in names]).reshape(1, 4 * R)
    b2b = jnp.concatenate([params[nm + "_b2"] for nm in names]).reshape(1, DYN_DIMS)

    # Fused static-graph distance parameters.
    pdim, ddim, edim = pop.shape[1], demo.shape[1], eco.shape[1]
    xs = jnp.concatenate([pop, demo, eco], axis=1)                   # [N, P]
    wblk = block_diag(params["W_pop"], params["W_demo"], params["W_eco"])        # [P, P]
    a1 = block_diag(params["a_pop"][:pdim], params["a_demo"][:ddim],
                    params["a_eco"][:edim])                          # [P, 3]
    a2t = block_diag(params["a_pop"][pdim:].T, params["a_demo"][ddim:].T,
                     params["a_eco"][edim:].T)                       # [3, P]
    geo_lin = (geo @ (params["W_geo"] @ params["a_geo"]))[..., 0]    # [N, N]

    # Fused LSTM weights (PyTorch gate order i, f, g, o already along 4R).
    wih = params["lstm_wih"]                                         # [42, 4R]
    whh = params["lstm_whh"]                                         # [R, 4R]
    blstm = params["lstm_b"].reshape(1, 4 * R)

    # Output head; attention scale (==2) folded into lin_w.
    lw2 = 2.0 * params["lin_w"]
    lb = params["lin_b"].reshape(1, R)
    l2w = params["lin2_w"]
    l2b = params["lin2_b"].reshape(1, 1)

    return (w1b, b1b, w2b, b2b, xs, wblk, a1, a2t, geo_lin,
            wih, whh, blstm, lw2, lb, l2w, l2b)


# ----------------------------------------------------------------------------- forward
@jax.jit
def hoist_forward(dynamic, prepared):
    N, T, F = dynamic.shape
    R = prepared[10].shape[0]                      # whh is [R, 4R]
    f32 = jnp.float32

    # (n,t) -> (t,n) reorder done here (trivial XLA transpose, no in-kernel matmul).
    x_tm = dynamic.transpose(1, 0, 2).reshape(T * N, F)

    inputs = (x_tm,) + tuple(prepared)
    out_shape = (jax.ShapeDtypeStruct((T * N, 1), f32),    # y (time-major column)
                 jax.ShapeDtypeStruct((N, N), f32),        # dist
                 jax.ShapeDtypeStruct((T * N, F), f32),    # total_weights (time-major)
                 jax.ShapeDtypeStruct((N, 2 * R), f32))    # h_n | c_n packed

    y_col, dist, tw_tm, hc = pl.pallas_call(
        _fused_kernel,
        out_shape=out_shape,
        in_specs=[_VMEM] * len(inputs),
        out_specs=tuple([_VMEM] * len(out_shape)),
    )(*inputs)

    y = y_col.reshape(T, N).transpose(1, 0)[:, :, None]            # [N, T, 1]
    total_weights = tw_tm.reshape(T, N, F).transpose(1, 0, 2)       # [N, T, F]
    h_n = hc[:, :R][None]
    c_n = hc[:, R:][None]
    return y, (dist, total_weights, (h_n, c_n))


# ----------------------------------------------------------------------------- params
def init_params(key, pop_dim, demo_dim, eco_dim, rnn_dim):
    keys = iter(jax.random.split(key, 32))

    def nrm(shape, scale=0.1):
        return scale * jax.random.normal(next(keys), shape, dtype=jnp.float32)

    p = {}
    for name, d in (("cov", F_COV), ("claim", F_CLAIM), ("hos", F_HOS), ("vac", F_VAC)):
        p[name + "_w1"] = nrm((d, rnn_dim))
        p[name + "_b1"] = nrm((rnn_dim,))
        p[name + "_w2"] = nrm((rnn_dim, d))
        p[name + "_b2"] = nrm((d,))
    p["lstm_wih"] = nrm((DYN_DIMS, 4 * rnn_dim))
    p["lstm_whh"] = nrm((rnn_dim, 4 * rnn_dim))
    p["lstm_b"] = nrm((4 * rnn_dim,))            # b_ih + b_hh combined
    p["lin_w"] = nrm((rnn_dim, rnn_dim))
    p["lin_b"] = nrm((rnn_dim,))
    p["lin2_w"] = nrm((rnn_dim, 1))
    p["lin2_b"] = nrm((1,))
    p["W_pop"] = nrm((pop_dim, pop_dim), 0.3)
    p["a_pop"] = nrm((2 * pop_dim, 1), 0.3)
    p["W_demo"] = nrm((demo_dim, demo_dim), 0.3)
    p["a_demo"] = nrm((2 * demo_dim, 1), 0.3)
    p["W_eco"] = nrm((eco_dim, eco_dim), 0.3)
    p["a_eco"] = nrm((2 * eco_dim, 1), 0.3)
    p["W_geo"] = nrm((2, 2), 0.3)
    p["a_geo"] = nrm((2, 1), 0.3)
    return p


# ----------------------------------------------------------------------------- pure-JAX reference
def reference_forward(dynamic, static, params):
    pop, demo, eco, geo = static
    N, T, F = dynamic.shape
    R = params["lstm_whh"].shape[0]

    def pair_d(x, W, a):
        h = x @ W
        P = h.shape[1]
        cat = jnp.concatenate([jnp.broadcast_to(h[:, None, :], (N, N, P)),
                               jnp.broadcast_to(h[None, :, :], (N, N, P))], axis=2)
        return jax.nn.sigmoid(cat @ a).reshape(N, N)

    d = pair_d(pop, params["W_pop"], params["a_pop"])
    d = d + pair_d(demo, params["W_demo"], params["a_demo"])
    d = d + pair_d(eco, params["W_eco"], params["a_eco"])
    d = d + jax.nn.sigmoid((geo @ params["W_geo"]) @ params["a_geo"]).reshape(N, N)
    dist = jax.nn.softmax(d, axis=-1)

    def mlp(x, name):
        h = jax.nn.leaky_relu(x @ params[name + "_w1"] + params[name + "_b1"])
        return jax.nn.sigmoid(h @ params[name + "_w2"] + params[name + "_b2"])

    x2 = dynamic.reshape(N * T, F)
    cov = mlp(x2[:, :1], "cov")
    clm = mlp(x2[:, 1:21], "claim")
    hos = mlp(x2[:, 21:25], "hos")
    vac = mlp(x2[:, 25:42], "vac")
    total_weights = jnp.concatenate([cov, clm, hos, -vac], axis=-1).reshape(N, T, F)

    xg = (total_weights * dynamic).transpose(1, 0, 2)
    wih, whh, b = params["lstm_wih"], params["lstm_whh"], params["lstm_b"]

    def step(carry, x_t):
        h, c = carry
        g = x_t @ wih + h @ whh + b
        i = jax.nn.sigmoid(g[:, :R])
        f = jax.nn.sigmoid(g[:, R:2 * R])
        gg = jnp.tanh(g[:, 2 * R:3 * R])
        o = jax.nn.sigmoid(g[:, 3 * R:])
        c = f * c + i * gg
        h = o * jnp.tanh(c)
        return (h, c), h

    (h_n, c_n), hs = lax.scan(step, (jnp.zeros((N, R)), jnp.zeros((N, R))), xg)
    h = hs.transpose(1, 0, 2)

    h_rep = jnp.broadcast_to(h[:, None], (N, N, T, R))
    h_att = h + (h_rep * dist[:, :, None, None]).sum(1)
    y = h_att @ params["lin_w"] + params["lin_b"]
    y = jax.nn.leaky_relu(y) @ params["lin2_w"] + params["lin2_b"]
    return y, (dist, total_weights, (h_n[None], c_n[None]))


# ----------------------------------------------------------------------------- main
if __name__ == "__main__":
    N, T, R = 8, 8, 32
    pop_dim, demo_dim, eco_dim = 8, 8, 4

    key = jax.random.PRNGKey(0)
    kp, kd, kpo, kde, kec, kge = jax.random.split(key, 6)
    params = init_params(kp, pop_dim, demo_dim, eco_dim, R)
    dynamic = jax.random.normal(kd, (N, T, DYN_DIMS), dtype=jnp.float32)
    pop = jax.random.normal(kpo, (N, pop_dim), dtype=jnp.float32)
    demo = jax.random.normal(kde, (N, demo_dim), dtype=jnp.float32)
    eco = jax.random.normal(kec, (N, eco_dim), dtype=jnp.float32)
    geo = jax.random.normal(kge, (N, N, 2), dtype=jnp.float32)
    static = (pop, demo, eco, geo)

    prepared = prepare_params(params, static)          # one-time packing
    out = hoist_forward(dynamic, prepared)
    out = jax.block_until_ready(out)
    y, (dist, tw, (h_n, c_n)) = out

    y_r, (dist_r, tw_r, (h_n_r, c_n_r)) = reference_forward(dynamic, static, params)
    np.testing.assert_allclose(np.asarray(dist), np.asarray(dist_r), atol=2e-4, rtol=2e-3)
    np.testing.assert_allclose(np.asarray(tw), np.asarray(tw_r), atol=2e-4, rtol=2e-3)
    np.testing.assert_allclose(np.asarray(h_n), np.asarray(h_n_r), atol=2e-4, rtol=2e-3)
    np.testing.assert_allclose(np.asarray(c_n), np.asarray(c_n_r), atol=2e-4, rtol=2e-3)
    np.testing.assert_allclose(np.asarray(y), np.asarray(y_r), atol=2e-4, rtol=2e-3)

    print("KERNEL_OK")
</pallas_src>

<mosaic_0001>
module attributes {stable_mosaic.version = 11 : i64} {
  func.func @_fused_kernel(%arg0: memref<64x42xf32, #tpu.memory_space<vmem>>, %arg1: memref<42x128xf32, #tpu.memory_space<vmem>>, %arg2: memref<1x128xf32, #tpu.memory_space<vmem>>, %arg3: memref<128x42xf32, #tpu.memory_space<vmem>>, %arg4: memref<1x42xf32, #tpu.memory_space<vmem>>, %arg5: memref<8x20xf32, #tpu.memory_space<vmem>>, %arg6: memref<20x20xf32, #tpu.memory_space<vmem>>, %arg7: memref<20x3xf32, #tpu.memory_space<vmem>>, %arg8: memref<3x20xf32, #tpu.memory_space<vmem>>, %arg9: memref<8x8xf32, #tpu.memory_space<vmem>>, %arg10: memref<42x128xf32, #tpu.memory_space<vmem>>, %arg11: memref<32x128xf32, #tpu.memory_space<vmem>>, %arg12: memref<1x128xf32, #tpu.memory_space<vmem>>, %arg13: memref<32x32xf32, #tpu.memory_space<vmem>>, %arg14: memref<1x32xf32, #tpu.memory_space<vmem>>, %arg15: memref<32x1xf32, #tpu.memory_space<vmem>>, %arg16: memref<1x1xf32, #tpu.memory_space<vmem>>, %arg17: memref<64x1xf32, #tpu.memory_space<vmem>>, %arg18: memref<8x8xf32, #tpu.memory_space<vmem>>, %arg19: memref<64x42xf32, #tpu.memory_space<vmem>>, %arg20: memref<8x64xf32, #tpu.memory_space<vmem>>) attributes {dimension_semantics = [], scalar_prefetch = 0 : i64, scratch_operands = 0 : i64, tpu.core_type = #tpu.core_type<tc>} {
    %c0 = arith.constant 0 : index
    %c0_0 = arith.constant 0 : index
    %0 = vector.load %arg0[%c0, %c0_0] : memref<64x42xf32, #tpu.memory_space<vmem>>, vector<64x42xf32>
    %c0_1 = arith.constant 0 : index
    %c0_2 = arith.constant 0 : index
    %1 = vector.load %arg1[%c0_1, %c0_2] : memref<42x128xf32, #tpu.memory_space<vmem>>, vector<42x128xf32>
    %cst = arith.constant dense<0.000000e+00> : vector<64x128xf32>
    %2 = tpu.matmul %0, %1, %cst {dimension_numbers = #tpu.dot_dimension_numbers<[1], [0], [0], [1], [0, 0, 1, 1], [], []>} : vector<64x42xf32>, vector<42x128xf32>, vector<64x128xf32> -> vector<64x128xf32>
    %c0_3 = arith.constant 0 : index
    %c0_4 = arith.constant 0 : index
    %3 = vector.load %arg2[%c0_3, %c0_4] : memref<1x128xf32, #tpu.memory_space<vmem>>, vector<1x128xf32>
    %4 = vector.broadcast %3 : vector<1x128xf32> to vector<64x128xf32>
    %5 = arith.addf %2, %4 : vector<64x128xf32>
    %cst_5 = arith.constant 0.000000e+00 : f32
    %6 = vector.broadcast %cst_5 : f32 to vector<64x128xf32>
    %7 = arith.cmpf ogt, %5, %6 : vector<64x128xf32>
    %cst_6 = arith.constant 0.00999999977 : f32
    %8 = vector.broadcast %cst_6 : f32 to vector<64x128xf32>
    %9 = arith.mulf %8, %5 : vector<64x128xf32>
    %10 = arith.select %7, %5, %9 : vector<64x128xi1>, vector<64x128xf32>
    %11 = tpu.iota {dimensions = array<i32: 1>} : vector<1x42xi32>
    %c25_i32 = arith.constant 25 : i32
    %12 = vector.broadcast %c25_i32 : i32 to vector<1x42xi32>
    %13 = arith.cmpi slt, %11, %12 : vector<1x42xi32>
    %cst_7 = arith.constant 1.000000e+00 : f32
    %cst_8 = arith.constant -1.000000e+00 : f32
    %14 = vector.broadcast %cst_7 : f32 to vector<1x42xf32>
    %15 = vector.broadcast %cst_8 : f32 to vector<1x42xf32>
    %16 = arith.select %13, %14, %15 : vector<1x42xi1>, vector<1x42xf32>
    %c0_9 = arith.constant 0 : index
    %c0_10 = arith.constant 0 : index
    %17 = vector.load %arg3[%c0_9, %c0_10] : memref<128x42xf32, #tpu.memory_space<vmem>>, vector<128x42xf32>
    %cst_11 = arith.constant dense<0.000000e+00> : vector<64x42xf32>
    %18 = tpu.matmul %10, %17, %cst_11 {dimension_numbers = #tpu.dot_dimension_numbers<[1], [0], [0], [1], [0, 0, 1, 1], [], []>} : vector<64x128xf32>, vector<128x42xf32>, vector<64x42xf32> -> vector<64x42xf32>
    %c0_12 = arith.constant 0 : index
    %c0_13 = arith.constant 0 : index
    %19 = vector.load %arg4[%c0_12, %c0_13] : memref<1x42xf32, #tpu.memory_space<vmem>>, vector<1x42xf32>
    %20 = vector.broadcast %19 : vector<1x42xf32> to vector<64x42xf32>
    %21 = arith.addf %18, %20 : vector<64x42xf32>
    %22 = arith.negf %21 : vector<64x42xf32>
    %23 = math.exp %22 : vector<64x42xf32>
    %cst_14 = arith.constant 1.000000e+00 : f32
    %24 = vector.broadcast %cst_14 : f32 to vector<64x42xf32>
    %25 = arith.addf %24, %23 : vector<64x42xf32>
    %26 = arith.divf %24, %25 : vector<64x42xf32>
    %27 = vector.broadcast %16 : vector<1x42xf32> to vector<64x42xf32>
    %28 = arith.mulf %27, %26 : vector<64x42xf32>
    %c0_15 = arith.constant 0 : index
    %c0_16 = arith.constant 0 : index
    %29 = vector.load %arg19[%c0_15, %c0_16] : memref<64x42xf32, #tpu.memory_space<vmem>>, vector<64x42xf32>
    tpu.vector_store %arg19[%c0_15, %c0_16], %28 {strides = array<i32>} : memref<64x42xf32, #tpu.memory_space<vmem>>, vector<64x42xf32>,
    %30 = arith.mulf %28, %0 : vector<64x42xf32>
    %c0_17 = arith.constant 0 : index
    %c0_18 = arith.constant 0 : index
    %31 = vector.load %arg5[%c0_17, %c0_18] : memref<8x20xf32, #tpu.memory_space<vmem>>, vector<8x20xf32>
    %c0_19 = arith.constant 0 : index
    %c0_20 = arith.constant 0 : index
    %32 = vector.load %arg6[%c0_19, %c0_20] : memref<20x20xf32, #tpu.memory_space<vmem>>, vector<20x20xf32>
    %cst_21 = arith.constant dense<0.000000e+00> : vector<8x20xf32>
    %33 = tpu.matmul %31, %32, %cst_21 {dimension_numbers = #tpu.dot_dimension_numbers<[1], [0], [0], [1], [0, 0, 1, 1], [], []>} : vector<8x20xf32>, vector<20x20xf32>, vector<8x20xf32> -> vector<8x20xf32>
    %c0_22 = arith.constant 0 : index
    %c0_23 = arith.constant 0 : index
    %34 = vector.load %arg7[%c0_22, %c0_23] : memref<20x3xf32, #tpu.memory_space<vmem>>, vector<20x3xf32>
    %cst_24 = arith.constant dense<0.000000e+00> : vector<8x3xf32>
    %35 = tpu.matmul %33, %34, %cst_24 {dimension_numbers = #tpu.dot_dimension_numbers<[1], [0], [0], [1], [0, 0, 1, 1], [], []>} : vector<8x20xf32>, vector<20x3xf32>, vector<8x3xf32> -> vector<8x3xf32>
    %c0_25 = arith.constant 0 : index
    %c0_26 = arith.constant 0 : index
    %36 = vector.load %arg8[%c0_25, %c0_26] : memref<3x20xf32, #tpu.memory_space<vmem>>, vector<3x20xf32>
    %cst_27 = arith.constant dense<0.000000e+00> : vector<3x8xf32>
    %37 = tpu.matmul %36, %33, %cst_27 {dimension_numbers = #tpu.dot_dimension_numbers<[1], [1], [0], [0], [0, 0, 1, 0], [], []>} : vector<3x20xf32>, vector<8x20xf32>, vector<3x8xf32> -> vector<3x8xf32>
    %c0_28 = arith.constant 0 : index
    %c0_29 = arith.constant 0 : index
    %38 = vector.load %arg9[%c0_28, %c0_29] : memref<8x8xf32, #tpu.memory_space<vmem>>, vector<8x8xf32>
    %39 = arith.negf %38 : vector<8x8xf32>
    %40 = math.exp %39 : vector<8x8xf32>
    %cst_30 = arith.constant 1.000000e+00 : f32
    %41 = vector.broadcast %cst_30 : f32 to vector<8x8xf32>
    %42 = arith.addf %41, %40 : vector<8x8xf32>
    %43 = arith.divf %41, %42 : vector<8x8xf32>
    %44 = vector.extract_strided_slice %35 {offsets = [0, 0], sizes = [8, 1], strides = [1, 1]} : vector<8x3xf32> to vector<8x1xf32>
    %45 = vector.extract_strided_slice %37 {offsets = [0, 0], sizes = [1, 8], strides = [1, 1]} : vector<3x8xf32> to vector<1x8xf32>
    %46 = vector.broadcast %44 : vector<8x1xf32> to vector<8x8xf32>
    %47 = vector.broadcast %45 : vector<1x8xf32> to vector<8x8xf32>
    %48 = arith.addf %46, %47 : vector<8x8xf32>
    %49 = arith.negf %48 : vector<8x8xf32>
    %50 = math.exp %49 : vector<8x8xf32>
    %cst_31 = arith.constant 1.000000e+00 : f32
    %51 = vector.broadcast %cst_31 : f32 to vector<8x8xf32>
    %52 = arith.addf %51, %50 : vector<8x8xf32>
    %53 = arith.divf %51, %52 : vector<8x8xf32>
    %54 = arith.addf %43, %53 : vector<8x8xf32>
    %55 = vector.extract_strided_slice %35 {offsets = [0, 1], sizes = [8, 1], strides = [1, 1]} : vector<8x3xf32> to vector<8x1xf32>
    %56 = vector.extract_strided_slice %37 {offsets = [1, 0], sizes = [1, 8], strides = [1, 1]} : vector<3x8xf32> to vector<1x8xf32>
    %57 = vector.broadcast %55 : vector<8x1xf32> to vector<8x8xf32>
    %58 = vector.broadcast %56 : vector<1x8xf32> to vector<8x8xf32>
    %59 = arith.addf %57, %58 : vector<8x8xf32>
    %60 = arith.negf %59 : vector<8x8xf32>
    %61 = math.exp %60 : vector<8x8xf32>
    %cst_32 = arith.constant 1.000000e+00 : f32
    %62 = vector.broadcast %cst_32 : f32 to vector<8x8xf32>
    %63 = arith.addf %62, %61 : vector<8x8xf32>
    %64 = arith.divf %62, %63 : vector<8x8xf32>
    %65 = arith.addf %54, %64 : vector<8x8xf32>
    %66 = vector.extract_strided_slice %35 {offsets = [0, 2], sizes = [8, 1], strides = [1, 1]} : vector<8x3xf32> to vector<8x1xf32>
    %67 = vector.extract_strided_slice %37 {offsets = [2, 0], sizes = [1, 8], strides = [1, 1]} : vector<3x8xf32> to vector<1x8xf32>
    %68 = vector.broadcast %66 : vector<8x1xf32> to vector<8x8xf32>
    %69 = vector.broadcast %67 : vector<1x8xf32> to vector<8x8xf32>
    %70 = arith.addf %68, %69 : vector<8x8xf32>
    %71 = arith.negf %70 : vector<8x8xf32>
    %72 = math.exp %71 : vector<8x8xf32>
    %cst_33 = arith.constant 1.000000e+00 : f32
    %73 = vector.broadcast %cst_33 : f32 to vector<8x8xf32>
    %74 = arith.addf %73, %72 : vector<8x8xf32>
    %75 = arith.divf %73, %74 : vector<8x8xf32>
    %76 = arith.addf %65, %75 : vector<8x8xf32>
    %cst_34 = arith.constant dense<0xFF800000> : vector<8xf32>
    %77 = vector.multi_reduction <maximumf>, %76, %cst_34 [1] : vector<8x8xf32> to vector<8xf32>
    %78 = vector.shape_cast %77 : vector<8xf32> to vector<8x1xf32>
    %79 = vector.broadcast %78 : vector<8x1xf32> to vector<8x8xf32>
    %80 = arith.subf %76, %79 : vector<8x8xf32>
    %81 = math.exp %80 : vector<8x8xf32>
    %cst_35 = arith.constant dense<0.000000e+00> : vector<8xf32>
    %82 = vector.multi_reduction <add>, %81, %cst_35 [1] : vector<8x8xf32> to vector<8xf32>
    %83 = vector.shape_cast %82 : vector<8xf32> to vector<8x1xf32>
    %84 = vector.broadcast %83 : vector<8x1xf32> to vector<8x8xf32>
    %85 = arith.divf %81, %84 : vector<8x8xf32>
    %c0_36 = arith.constant 0 : index
    %c0_37 = arith.constant 0 : index
    %86 = vector.load %arg18[%c0_36, %c0_37] : memref<8x8xf32, #tpu.memory_space<vmem>>, vector<8x8xf32>
    tpu.vector_store %arg18[%c0_36, %c0_37], %85 {strides = array<i32>} : memref<8x8xf32, #tpu.memory_space<vmem>>, vector<8x8xf32>,
    %c0_38 = arith.constant 0 : index
    %c0_39 = arith.constant 0 : index
    %87 = vector.load %arg10[%c0_38, %c0_39] : memref<42x128xf32, #tpu.memory_space<vmem>>, vector<42x128xf32>
    %cst_40 = arith.constant dense<0.000000e+00> : vector<64x128xf32>
    %88 = tpu.matmul %30, %87, %cst_40 {dimension_numbers = #tpu.dot_dimension_numbers<[1], [0], [0], [1], [0, 0, 1, 1], [], []>} : vector<64x42xf32>, vector<42x128xf32>, vector<64x128xf32> -> vector<64x128xf32>
    %c0_41 = arith.constant 0 : index
    %c0_42 = arith.constant 0 : index
    %89 = vector.load %arg12[%c0_41, %c0_42] : memref<1x128xf32, #tpu.memory_space<vmem>>, vector<1x128xf32>
    %90 = vector.broadcast %89 : vector<1x128xf32> to vector<64x128xf32>
    %91 = arith.addf %88, %90 : vector<64x128xf32>
    %c0_43 = arith.constant 0 : index
    %c0_44 = arith.constant 0 : index
    %92 = vector.load %arg11[%c0_43, %c0_44] : memref<32x128xf32, #tpu.memory_space<vmem>>, vector<32x128xf32>
    %cst_45 = arith.constant 0.000000e+00 : f32
    %93 = vector.broadcast %cst_45 : f32 to vector<8x32xf32>
    %cst_46 = arith.constant 0.000000e+00 : f32
    %94 = vector.broadcast %cst_46 : f32 to vector<8x32xf32>
    %95 = vector.extract_strided_slice %91 {offsets = [0, 0], sizes = [8, 128], strides = [1, 1]} : vector<64x128xf32> to vector<8x128xf32>
    %cst_47 = arith.constant dense<0.000000e+00> : vector<8x128xf32>
    %96 = tpu.matmul %93, %92, %cst_47 {dimension_numbers = #tpu.dot_dimension_numbers<[1], [0], [0], [1], [0, 0, 1, 1], [], []>} : vector<8x32xf32>, vector<32x128xf32>, vector<8x128xf32> -> vector<8x128xf32>
    %97 = arith.addf %95, %96 : vector<8x128xf32>
    %98 = vector.extract_strided_slice %97 {offsets = [0, 0], sizes = [8, 32], strides = [1, 1]} : vector<8x128xf32> to vector<8x32xf32>
    %99 = arith.negf %98 : vector<8x32xf32>
    %100 = math.exp %99 : vector<8x32xf32>
    %cst_48 = arith.constant 1.000000e+00 : f32
    %101 = vector.broadcast %cst_48 : f32 to vector<8x32xf32>
    %102 = arith.addf %101, %100 : vector<8x32xf32>
    %103 = arith.divf %101, %102 : vector<8x32xf32>
    %104 = vector.extract_strided_slice %97 {offsets = [0, 32], sizes = [8, 32], strides = [1, 1]} : vector<8x128xf32> to vector<8x32xf32>
    %105 = arith.negf %104 : vector<8x32xf32>
    %106 = math.exp %105 : vector<8x32xf32>
    %cst_49 = arith.constant 1.000000e+00 : f32
    %107 = vector.broadcast %cst_49 : f32 to vector<8x32xf32>
    %108 = arith.addf %107, %106 : vector<8x32xf32>
    %109 = arith.divf %107, %108 : vector<8x32xf32>
    %110 = vector.extract_strided_slice %97 {offsets = [0, 64], sizes = [8, 32], strides = [1, 1]} : vector<8x128xf32> to vector<8x32xf32>
    %111 = math.tanh %110 : vector<8x32xf32>
    %112 = vector.extract_strided_slice %97 {offsets = [0, 96], sizes = [8, 32], strides = [1, 1]} : vector<8x128xf32> to vector<8x32xf32>
    %113 = arith.negf %112 : vector<8x32xf32>
    %114 = math.exp %113 : vector<8x32xf32>
    %cst_50 = arith.constant 1.000000e+00 : f32
    %115 = vector.broadcast %cst_50 : f32 to vector<8x32xf32>
    %116 = arith.addf %115, %114 : vector<8x32xf32>
    %117 = arith.divf %115, %116 : vector<8x32xf32>
    %118 = arith.mulf %109, %94 : vector<8x32xf32>
    %119 = arith.mulf %103, %111 : vector<8x32xf32>
    %120 = arith.addf %118, %119 : vector<8x32xf32>
    %121 = math.tanh %120 : vector<8x32xf32>
    %122 = arith.mulf %117, %121 : vector<8x32xf32>
    %123 = vector.extract_strided_slice %91 {offsets = [8, 0], sizes = [8, 128], strides = [1, 1]} : vector<64x128xf32> to vector<8x128xf32>
    %cst_51 = arith.constant dense<0.000000e+00> : vector<8x128xf32>
    %124 = tpu.matmul %122, %92, %cst_51 {dimension_numbers = #tpu.dot_dimension_numbers<[1], [0], [0], [1], [0, 0, 1, 1], [], []>} : vector<8x32xf32>, vector<32x128xf32>, vector<8x128xf32> -> vector<8x128xf32>
    %125 = arith.addf %123, %124 : vector<8x128xf32>
    %126 = vector.extract_strided_slice %125 {offsets = [0, 0], sizes = [8, 32], strides = [1, 1]} : vector<8x128xf32> to vector<8x32xf32>
    %127 = arith.negf %126 : vector<8x32xf32>
    %128 = math.exp %127 : vector<8x32xf32>
    %cst_52 = arith.constant 1.000000e+00 : f32
    %129 = vector.broadcast %cst_52 : f32 to vector<8x32xf32>
    %130 = arith.addf %129, %128 : vector<8x32xf32>
    %131 = arith.divf %129, %130 : vector<8x32xf32>
    %132 = vector.extract_strided_slice %125 {offsets = [0, 32], sizes = [8, 32], strides = [1, 1]} : vector<8x128xf32> to vector<8x32xf32>
    %133 = arith.negf %132 : vector<8x32xf32>
    %134 = math.exp %133 : vector<8x32xf32>
    %cst_53 = arith.constant 1.000000e+00 : f32
    %135 = vector.broadcast %cst_53 : f32 to vector<8x32xf32>
    %136 = arith.addf %135, %134 : vector<8x32xf32>
    %137 = arith.divf %135, %136 : vector<8x32xf32>
    %138 = vector.extract_strided_slice %125 {offsets = [0, 64], sizes = [8, 32], strides = [1, 1]} : vector<8x128xf32> to vector<8x32xf32>
    %139 = math.tanh %138 : vector<8x32xf32>
    %140 = vector.extract_strided_slice %125 {offsets = [0, 96], sizes = [8, 32], strides = [1, 1]} : vector<8x128xf32> to vector<8x32xf32>
    %141 = arith.negf %140 : vector<8x32xf32>
    %142 = math.exp %141 : vector<8x32xf32>
    %cst_54 = arith.constant 1.000000e+00 : f32
    %143 = vector.broadcast %cst_54 : f32 to vector<8x32xf32>
    %144 = arith.addf %143, %142 : vector<8x32xf32>
    %145 = arith.divf %143, %144 : vector<8x32xf32>
    %146 = arith.mulf %137, %120 : vector<8x32xf32>
    %147 = arith.mulf %131, %139 : vector<8x32xf32>
    %148 = arith.addf %146, %147 : vector<8x32xf32>
    %149 = math.tanh %148 : vector<8x32xf32>
    %150 = arith.mulf %145, %149 : vector<8x32xf32>
    %151 = vector.extract_strided_slice %91 {offsets = [16, 0], sizes = [8, 128], strides = [1, 1]} : vector<64x128xf32> to vector<8x128xf32>
    %cst_55 = arith.constant dense<0.000000e+00> : vector<8x128xf32>
    %152 = tpu.matmul %150, %92, %cst_55 {dimension_numbers = #tpu.dot_dimension_numbers<[1], [0], [0], [1], [0, 0, 1, 1], [], []>} : vector<8x32xf32>, vector<32x128xf32>, vector<8x128xf32> -> vector<8x128xf32>
    %153 = arith.addf %151, %152 : vector<8x128xf32>
    %154 = vector.extract_strided_slice %153 {offsets = [0, 0], sizes = [8, 32], strides = [1, 1]} : vector<8x128xf32> to vector<8x32xf32>
    %155 = arith.negf %154 : vector<8x32xf32>
    %156 = math.exp %155 : vector<8x32xf32>
    %cst_56 = arith.constant 1.000000e+00 : f32
    %157 = vector.broadcast %cst_56 : f32 to vector<8x32xf32>
    %158 = arith.addf %157, %156 : vector<8x32xf32>
    %159 = arith.divf %157, %158 : vector<8x32xf32>
    %160 = vector.extract_strided_slice %153 {offsets = [0, 32], sizes = [8, 32], strides = [1, 1]} : vector<8x128xf32> to vector<8x32xf32>
    %161 = arith.negf %160 : vector<8x32xf32>
    %162 = math.exp %161 : vector<8x32xf32>
    %cst_57 = arith.constant 1.000000e+00 : f32
    %163 = vector.broadcast %cst_57 : f32 to vector<8x32xf32>
    %164 = arith.addf %163, %162 : vector<8x32xf32>
    %165 = arith.divf %163, %164 : vector<8x32xf32>
    %166 = vector.extract_strided_slice %153 {offsets = [0, 64], sizes = [8, 32], strides = [1, 1]} : vector<8x128xf32> to vector<8x32xf32>
    %167 = math.tanh %166 : vector<8x32xf32>
    %168 = vector.extract_strided_slice %153 {offsets = [0, 96], sizes = [8, 32], strides = [1, 1]} : vector<8x128xf32> to vector<8x32xf32>
    %169 = arith.negf %168 : vector<8x32xf32>
    %170 = math.exp %169 : vector<8x32xf32>
    %cst_58 = arith.constant 1.000000e+00 : f32
    %171 = vector.broadcast %cst_58 : f32 to vector<8x32xf32>
    %172 = arith.addf %171, %170 : vector<8x32xf32>
    %173 = arith.divf %171, %172 : vector<8x32xf32>
    %174 = arith.mulf %165, %148 : vector<8x32xf32>
    %175 = arith.mulf %159, %167 : vector<8x32xf32>
    %176 = arith.addf %174, %175 : vector<8x32xf32>
    %177 = math.tanh %176 : vector<8x32xf32>
    %178 = arith.mulf %173, %177 : vector<8x32xf32>
    %179 = vector.extract_strided_slice %91 {offsets = [24, 0], sizes = [8, 128], strides = [1, 1]} : vector<64x128xf32> to vector<8x128xf32>
    %cst_59 = arith.constant dense<0.000000e+00> : vector<8x128xf32>
    %180 = tpu.matmul %178, %92, %cst_59 {dimension_numbers = #tpu.dot_dimension_numbers<[1], [0], [0], [1], [0, 0, 1, 1], [], []>} : vector<8x32xf32>, vector<32x128xf32>, vector<8x128xf32> -> vector<8x128xf32>
    %181 = arith.addf %179, %180 : vector<8x128xf32>
    %182 = vector.extract_strided_slice %181 {offsets = [0, 0], sizes = [8, 32], strides = [1, 1]} : vector<8x128xf32> to vector<8x32xf32>
    %183 = arith.negf %182 : vector<8x32xf32>
    %184 = math.exp %183 : vector<8x32xf32>
    %cst_60 = arith.constant 1.000000e+00 : f32
    %185 = vector.broadcast %cst_60 : f32 to vector<8x32xf32>
    %186 = arith.addf %185, %184 : vector<8x32xf32>
    %187 = arith.divf %185, %186 : vector<8x32xf32>
    %188 = vector.extract_strided_slice %181 {offsets = [0, 32], sizes = [8, 32], strides = [1, 1]} : vector<8x128xf32> to vector<8x32xf32>
    %189 = arith.negf %188 : vector<8x32xf32>
    %190 = math.exp %189 : vector<8x32xf32>
    %cst_61 = arith.constant 1.000000e+00 : f32
    %191 = vector.broadcast %cst_61 : f32 to vector<8x32xf32>
    %192 = arith.addf %191, %190 : vector<8x32xf32>
    %193 = arith.divf %191, %192 : vector<8x32xf32>
    %194 = vector.extract_strided_slice %181 {offsets = [0, 64], sizes = [8, 32], strides = [1, 1]} : vector<8x128xf32> to vector<8x32xf32>
    %195 = math.tanh %194 : vector<8x32xf32>
    %196 = vector.extract_strided_slice %181 {offsets = [0, 96], sizes = [8, 32], strides = [1, 1]} : vector<8x128xf32> to vector<8x32xf32>
    %197 = arith.negf %196 : vector<8x32xf32>
    %198 = math.exp %197 : vector<8x32xf32>
    %cst_62 = arith.constant 1.000000e+00 : f32
    %199 = vector.broadcast %cst_62 : f32 to vector<8x32xf32>
    %200 = arith.addf %199, %198 : vector<8x32xf32>
    %201 = arith.divf %199, %200 : vector<8x32xf32>
    %202 = arith.mulf %193, %176 : vector<8x32xf32>
    %203 = arith.mulf %187, %195 : vector<8x32xf32>
    %204 = arith.addf %202, %203 : vector<8x32xf32>
    %205 = math.tanh %204 : vector<8x32xf32>
    %206 = arith.mulf %201, %205 : vector<8x32xf32>
    %207 = vector.extract_strided_slice %91 {offsets = [32, 0], sizes = [8, 128], strides = [1, 1]} : vector<64x128xf32> to vector<8x128xf32>
    %cst_63 = arith.constant dense<0.000000e+00> : vector<8x128xf32>
    %208 = tpu.matmul %206, %92, %cst_63 {dimension_numbers = #tpu.dot_dimension_numbers<[1], [0], [0], [1], [0, 0, 1, 1], [], []>} : vector<8x32xf32>, vector<32x128xf32>, vector<8x128xf32> -> vector<8x128xf32>
    %209 = arith.addf %207, %208 : vector<8x128xf32>
    %210 = vector.extract_strided_slice %209 {offsets = [0, 0], sizes = [8, 32], strides = [1, 1]} : vector<8x128xf32> to vector<8x32xf32>
    %211 = arith.negf %210 : vector<8x32xf32>
    %212 = math.exp %211 : vector<8x32xf32>
    %cst_64 = arith.constant 1.000000e+00 : f32
    %213 = vector.broadcast %cst_64 : f32 to vector<8x32xf32>
    %214 = arith.addf %213, %212 : vector<8x32xf32>
    %215 = arith.divf %213, %214 : vector<8x32xf32>
    %216 = vector.extract_strided_slice %209 {offsets = [0, 32], sizes = [8, 32], strides = [1, 1]} : vector<8x128xf32> to vector<8x32xf32>
    %217 = arith.negf %216 : vector<8x32xf32>
    %218 = math.exp %217 : vector<8x32xf32>
    %cst_65 = arith.constant 1.000000e+00 : f32
    %219 = vector.broadcast %cst_65 : f32 to vector<8x32xf32>
    %220 = arith.addf %219, %218 : vector<8x32xf32>
    %221 = arith.divf %219, %220 : vector<8x32xf32>
    %222 = vector.extract_strided_slice %209 {offsets = [0, 64], sizes = [8, 32], strides = [1, 1]} : vector<8x128xf32> to vector<8x32xf32>
    %223 = math.tanh %222 : vector<8x32xf32>
    %224 = vector.extract_strided_slice %209 {offsets = [0, 96], sizes = [8, 32], strides = [1, 1]} : vector<8x128xf32> to vector<8x32xf32>
    %225 = arith.negf %224 : vector<8x32xf32>
    %226 = math.exp %225 : vector<8x32xf32>
    %cst_66 = arith.constant 1.000000e+00 : f32
    %227 = vector.broadcast %cst_66 : f32 to vector<8x32xf32>
    %228 = arith.addf %227, %226 : vector<8x32xf32>
    %229 = arith.divf %227, %228 : vector<8x32xf32>
    %230 = arith.mulf %221, %204 : vector<8x32xf32>
    %231 = arith.mulf %215, %223 : vector<8x32xf32>
    %232 = arith.addf %230, %231 : vector<8x32xf32>
    %233 = math.tanh %232 : vector<8x32xf32>
    %234 = arith.mulf %229, %233 : vector<8x32xf32>
    %235 = vector.extract_strided_slice %91 {offsets = [40, 0], sizes = [8, 128], strides = [1, 1]} : vector<64x128xf32> to vector<8x128xf32>
    %cst_67 = arith.constant dense<0.000000e+00> : vector<8x128xf32>
    %236 = tpu.matmul %234, %92, %cst_67 {dimension_numbers = #tpu.dot_dimension_numbers<[1], [0], [0], [1], [0, 0, 1, 1], [], []>} : vector<8x32xf32>, vector<32x128xf32>, vector<8x128xf32> -> vector<8x128xf32>
    %237 = arith.addf %235, %236 : vector<8x128xf32>
    %238 = vector.extract_strided_slice %237 {offsets = [0, 0], sizes = [8, 32], strides = [1, 1]} : vector<8x128xf32> to vector<8x32xf32>
    %239 = arith.negf %238 : vector<8x32xf32>
    %240 = math.exp %239 : vector<8x32xf32>
    %cst_68 = arith.constant 1.000000e+00 : f32
    %241 = vector.broadcast %cst_68 : f32 to vector<8x32xf32>
    %242 = arith.addf %241, %240 : vector<8x32xf32>
    %243 = arith.divf %241, %242 : vector<8x32xf32>
    %244 = vector.extract_strided_slice %237 {offsets = [0, 32], sizes = [8, 32], strides = [1, 1]} : vector<8x128xf32> to vector<8x32xf32>
    %245 = arith.negf %244 : vector<8x32xf32>
    %246 = math.exp %245 : vector<8x32xf32>
    %cst_69 = arith.constant 1.000000e+00 : f32
    %247 = vector.broadcast %cst_69 : f32 to vector<8x32xf32>
    %248 = arith.addf %247, %246 : vector<8x32xf32>
    %249 = arith.divf %247, %248 : vector<8x32xf32>
    %250 = vector.extract_strided_slice %237 {offsets = [0, 64], sizes = [8, 32], strides = [1, 1]} : vector<8x128xf32> to vector<8x32xf32>
    %251 = math.tanh %250 : vector<8x32xf32>
    %252 = vector.extract_strided_slice %237 {offsets = [0, 96], sizes = [8, 32], strides = [1, 1]} : vector<8x128xf32> to vector<8x32xf32>
    %253 = arith.negf %252 : vector<8x32xf32>
    %254 = math.exp %253 : vector<8x32xf32>
    %cst_70 = arith.constant 1.000000e+00 : f32
    %255 = vector.broadcast %cst_70 : f32 to vector<8x32xf32>
    %256 = arith.addf %255, %254 : vector<8x32xf32>
    %257 = arith.divf %255, %256 : vector<8x32xf32>
    %258 = arith.mulf %249, %232 : vector<8x32xf32>
    %259 = arith.mulf %243, %251 : vector<8x32xf32>
    %260 = arith.addf %258, %259 : vector<8x32xf32>
    %261 = math.tanh %260 : vector<8x32xf32>
    %262 = arith.mulf %257, %261 : vector<8x32xf32>
    %263 = vector.extract_strided_slice %91 {offsets = [48, 0], sizes = [8, 128], strides = [1, 1]} : vector<64x128xf32> to vector<8x128xf32>
    %cst_71 = arith.constant dense<0.000000e+00> : vector<8x128xf32>
    %264 = tpu.matmul %262, %92, %cst_71 {dimension_numbers = #tpu.dot_dimension_numbers<[1], [0], [0], [1], [0, 0, 1, 1], [], []>} : vector<8x32xf32>, vector<32x128xf32>, vector<8x128xf32> -> vector<8x128xf32>
    %265 = arith.addf %263, %264 : vector<8x128xf32>
    %266 = vector.extract_strided_slice %265 {offsets = [0, 0], sizes = [8, 32], strides = [1, 1]} : vector<8x128xf32> to vector<8x32xf32>
    %267 = arith.negf %266 : vector<8x32xf32>
    %268 = math.exp %267 : vector<8x32xf32>
    %cst_72 = arith.constant 1.000000e+00 : f32
    %269 = vector.broadcast %cst_72 : f32 to vector<8x32xf32>
    %270 = arith.addf %269, %268 : vector<8x32xf32>
    %271 = arith.divf %269, %270 : vector<8x32xf32>
    %272 = vector.extract_strided_slice %265 {offsets = [0, 32], sizes = [8, 32], strides = [1, 1]} : vector<8x128xf32> to vector<8x32xf32>
    %273 = arith.negf %272 : vector<8x32xf32>
    %274 = math.exp %273 : vector<8x32xf32>
    %cst_73 = arith.constant 1.000000e+00 : f32
    %275 = vector.broadcast %cst_73 : f32 to vector<8x32xf32>
    %276 = arith.addf %275, %274 : vector<8x32xf32>
    %277 = arith.divf %275, %276 : vector<8x32xf32>
    %278 = vector.extract_strided_slice %265 {offsets = [0, 64], sizes = [8, 32], strides = [1, 1]} : vector<8x128xf32> to vector<8x32xf32>
    %279 = math.tanh %278 : vector<8x32xf32>
    %280 = vector.extract_strided_slice %265 {offsets = [0, 96], sizes = [8, 32], strides = [1, 1]} : vector<8x128xf32> to vector<8x32xf32>
    %281 = arith.negf %280 : vector<8x32xf32>
    %282 = math.exp %281 : vector<8x32xf32>
    %cst_74 = arith.constant 1.000000e+00 : f32
    %283 = vector.broadcast %cst_74 : f32 to vector<8x32xf32>
    %284 = arith.addf %283, %282 : vector<8x32xf32>
    %285 = arith.divf %283, %284 : vector<8x32xf32>
    %286 = arith.mulf %277, %260 : vector<8x32xf32>
    %287 = arith.mulf %271, %279 : vector<8x32xf32>
    %288 = arith.addf %286, %287 : vector<8x32xf32>
    %289 = math.tanh %288 : vector<8x32xf32>
    %290 = arith.mulf %285, %289 : vector<8x32xf32>
    %291 = vector.extract_strided_slice %91 {offsets = [56, 0], sizes = [8, 128], strides = [1, 1]} : vector<64x128xf32> to vector<8x128xf32>
    %cst_75 = arith.constant dense<0.000000e+00> : vector<8x128xf32>
    %292 = tpu.matmul %290, %92, %cst_75 {dimension_numbers = #tpu.dot_dimension_numbers<[1], [0], [0], [1], [0, 0, 1, 1], [], []>} : vector<8x32xf32>, vector<32x128xf32>, vector<8x128xf32> -> vector<8x128xf32>
    %293 = arith.addf %291, %292 : vector<8x128xf32>
    %294 = vector.extract_strided_slice %293 {offsets = [0, 0], sizes = [8, 32], strides = [1, 1]} : vector<8x128xf32> to vector<8x32xf32>
    %295 = arith.negf %294 : vector<8x32xf32>
    %296 = math.exp %295 : vector<8x32xf32>
    %cst_76 = arith.constant 1.000000e+00 : f32
    %297 = vector.broadcast %cst_76 : f32 to vector<8x32xf32>
    %298 = arith.addf %297, %296 : vector<8x32xf32>
    %299 = arith.divf %297, %298 : vector<8x32xf32>
    %300 = vector.extract_strided_slice %293 {offsets = [0, 32], sizes = [8, 32], strides = [1, 1]} : vector<8x128xf32> to vector<8x32xf32>
    %301 = arith.negf %300 : vector<8x32xf32>
    %302 = math.exp %301 : vector<8x32xf32>
    %cst_77 = arith.constant 1.000000e+00 : f32
    %303 = vector.broadcast %cst_77 : f32 to vector<8x32xf32>
    %304 = arith.addf %303, %302 : vector<8x32xf32>
    %305 = arith.divf %303, %304 : vector<8x32xf32>
    %306 = vector.extract_strided_slice %293 {offsets = [0, 64], sizes = [8, 32], strides = [1, 1]} : vector<8x128xf32> to vector<8x32xf32>
    %307 = math.tanh %306 : vector<8x32xf32>
    %308 = vector.extract_strided_slice %293 {offsets = [0, 96], sizes = [8, 32], strides = [1, 1]} : vector<8x128xf32> to vector<8x32xf32>
    %309 = arith.negf %308 : vector<8x32xf32>
    %310 = math.exp %309 : vector<8x32xf32>
    %cst_78 = arith.constant 1.000000e+00 : f32
    %311 = vector.broadcast %cst_78 : f32 to vector<8x32xf32>
    %312 = arith.addf %311, %310 : vector<8x32xf32>
    %313 = arith.divf %311, %312 : vector<8x32xf32>
    %314 = arith.mulf %305, %288 : vector<8x32xf32>
    %315 = arith.mulf %299, %307 : vector<8x32xf32>
    %316 = arith.addf %314, %315 : vector<8x32xf32>
    %317 = math.tanh %316 : vector<8x32xf32>
    %318 = arith.mulf %313, %317 : vector<8x32xf32>
    %c0_79 = arith.constant 0 : index
    %c0_80 = arith.constant 0 : index
    %319 = vector.load %arg20[%c0_79, %c0_80] : memref<8x64xf32, #tpu.memory_space<vmem>>, vector<8x32xf32>
    tpu.vector_store %arg20[%c0_79, %c0_80], %318 {strides = array<i32>} : memref<8x64xf32, #tpu.memory_space<vmem>>, vector<8x32xf32>,
    %c0_81 = arith.constant 0 : index
    %c32 = arith.constant 32 : index
    %320 = vector.load %arg20[%c0_81, %c32] : memref<8x64xf32, #tpu.memory_space<vmem>>, vector<8x32xf32>
    tpu.vector_store %arg20[%c0_81, %c32], %316 {strides = array<i32>} : memref<8x64xf32, #tpu.memory_space<vmem>>, vector<8x32xf32>,
    %321 = tpu.concatenate %122, %150, %178, %206, %234, %262, %290, %318 in 0 : vector<8x32xf32>, vector<8x32xf32>, vector<8x32xf32>, vector<8x32xf32>, vector<8x32xf32>, vector<8x32xf32>, vector<8x32xf32>, vector<8x32xf32> -> vector<64x32xf32>
    %c0_82 = arith.constant 0 : index
    %c0_83 = arith.constant 0 : index
    %322 = vector.load %arg13[%c0_82, %c0_83] : memref<32x32xf32, #tpu.memory_space<vmem>>, vector<32x32xf32>
    %cst_84 = arith.constant dense<0.000000e+00> : vector<64x32xf32>
    %323 = tpu.matmul %321, %322, %cst_84 {dimension_numbers = #tpu.dot_dimension_numbers<[1], [0], [0], [1], [0, 0, 1, 1], [], []>} : vector<64x32xf32>, vector<32x32xf32>, vector<64x32xf32> -> vector<64x32xf32>
    %c0_85 = arith.constant 0 : index
    %c0_86 = arith.constant 0 : index
    %324 = vector.load %arg14[%c0_85, %c0_86] : memref<1x32xf32, #tpu.memory_space<vmem>>, vector<1x32xf32>
    %325 = vector.broadcast %324 : vector<1x32xf32> to vector<64x32xf32>
    %326 = arith.addf %323, %325 : vector<64x32xf32>
    %cst_87 = arith.constant 0.000000e+00 : f32
    %327 = vector.broadcast %cst_87 : f32 to vector<64x32xf32>
    %328 = arith.cmpf ogt, %326, %327 : vector<64x32xf32>
    %cst_88 = arith.constant 0.00999999977 : f32
    %329 = vector.broadcast %cst_88 : f32 to vector<64x32xf32>
    %330 = arith.mulf %329, %326 : vector<64x32xf32>
    %331 = arith.select %328, %326, %330 : vector<64x32xi1>, vector<64x32xf32>
    %c0_89 = arith.constant 0 : index
    %c0_90 = arith.constant 0 : index
    %332 = vector.load %arg15[%c0_89, %c0_90] : memref<32x1xf32, #tpu.memory_space<vmem>>, vector<32x1xf32>
    %cst_91 = arith.constant dense<0.000000e+00> : vector<64x1xf32>
    %333 = tpu.matmul %331, %332, %cst_91 {dimension_numbers = #tpu.dot_dimension_numbers<[1], [0], [0], [1], [0, 0, 1, 1], [], []>} : vector<64x32xf32>, vector<32x1xf32>, vector<64x1xf32> -> vector<64x1xf32>
    %c0_92 = arith.constant 0 : index
    %c0_93 = arith.constant 0 : index
    %334 = vector.load %arg16[%c0_92, %c0_93] : memref<1x1xf32, #tpu.memory_space<vmem>>, vector<1x1xf32>
    %335 = vector.broadcast %334 : vector<1x1xf32> to vector<64x1xf32>
    %336 = arith.addf %333, %335 : vector<64x1xf32>
    %c0_94 = arith.constant 0 : index
    %c0_95 = arith.constant 0 : index
    %337 = vector.load %arg17[%c0_94, %c0_95] : memref<64x1xf32, #tpu.memory_space<vmem>>, vector<64x1xf32>
    tpu.vector_store %arg17[%c0_94, %c0_95], %336 {strides = array<i32>} : memref<64x1xf32, #tpu.memory_space<vmem>>, vector<64x1xf32>,
    return
  }
}

</mosaic_0001>

<bundles_post_ra>
// kernel: hoist_forward.1
= control target key start
LH: loop header
LB: loop body
LE: loop exit
PB: predicated region body
PF: predicated region fallthrough
CT: control target
= control target key end

     0   :  { %s3287_s0 = inlined_call_operand.vmem [shape: f32[64,42], index: 0, kind: input, shape index: {}]   ;;  %s3288_s1 = inlined_call_operand.vmem [shape: f32[42,128], index: 1, kind: input, shape index: {}]   ;;  %s3289_s2 = inlined_call_operand.vmem [shape: f32[1,128], index: 2, kind: input, shape index: {}]   ;;  %s3290_s3 = inlined_call_operand.vmem [shape: f32[128,42], index: 3, kind: input, shape index: {}]   ;;  %s3291_s4 = inlined_call_operand.vmem [shape: f32[1,42], index: 4, kind: input, shape index: {}]   ;;  %s3292_s5 = inlined_call_operand.vmem [shape: f32[8,20], index: 5, kind: input, shape index: {}]   ;;  %s3293_s6 = inlined_call_operand.vmem [shape: f32[20,20], index: 6, kind: input, shape index: {}]   ;;  %s3294_s7 = inlined_call_operand.vmem [shape: f32[20,3], index: 7, kind: input, shape index: {}]   ;;  %s3295_s8 = inlined_call_operand.vmem [shape: f32[3,20], index: 8, kind: input, shape index: {}]   ;;  %s3296_s9 = inlined_call_operand.vmem [shape: f32[8,8], index: 9, kind: input, shape index: {}]   ;;  %s3297_s10 = inlined_call_operand.vmem [shape: f32[42,128], index: 10, kind: input, shape index: {}]   ;;  %s3298_s11 = inlined_call_operand.vmem [shape: f32[32,128], index: 11, kind: input, shape index: {}]   ;;  %s3299_s12 = inlined_call_operand.vmem [shape: f32[1,128], index: 12, kind: input, shape index: {}]   ;;  %s3300_s13 = inlined_call_operand.vmem [shape: f32[32,32], index: 13, kind: input, shape index: {}]   ;;  %s3301_s14 = inlined_call_operand.vmem [shape: f32[1,32], index: 14, kind: input, shape index: {}]   ;;  %s3302_s15 = inlined_call_operand.vmem [shape: f32[32,1], index: 15, kind: input, shape index: {}]   ;;  %s3303_s16 = inlined_call_operand.<no memory space> [shape: f32[1,1], index: 16, kind: input, shape index: {}]   ;;  %s3304_s17 = inlined_call_operand.vmem [shape: f32[64,1], index: 17, kind: output, shape index: {0}]   ;;  %s3305_s18 = inlined_call_operand.hbm [shape: f32[8,8], index: 18, kind: output, shape index: {1}]   ;;  %s3306_s19 = inlined_call_operand.vmem [shape: f32[64,42], index: 19, kind: output, shape index: {2}]   ;;  %s3307_s20 = inlined_call_operand.vmem [shape: f32[8,64], index: 20, kind: output, shape index: {3}]  }
   0x1   :  { %3311 = sst [smem:[#allocation6_spill]] %s3287_s0  ;;  %v26_v0 = vstv %s3303_s16 }
   0x2   :  { %3312 = sst [smem:[#allocation7_spill]] %s3288_s1  ;;  %27 = vst [vmem:[#allocation2] sm:$0x1] %v26_v0 }
   0x3   :  { %3313 = sst [smem:[#allocation8_spill]] %s3289_s2 }
   0x4   :  { %3314 = sst [smem:[#allocation9_spill]] %s3290_s3 }
   0x5   :  { %3315 = sst [smem:[#allocation10_spill]] %s3291_s4 }
   0x6   :  { %s3316_s2 = sld [smem:[#allocation7_spill]]  ;;  %vm109_vm0 = vcmask 1041408   ;;  %vm84_vm1 = vcmask 343040  }
   0x7   :  { %s3317_s4 = sld [smem:[#allocation6_spill]] }
   0x8   :  { %s3318_s0 = sld [smem:[#allocation9_spill]] }
   0xc   :  { %v76_v1 = vld [vmem:[%s3316_s2 + $0x28] sm:$0x3]  ;;  %v75_v2 = vld [vmem:[%s3316_s2 + $0x20] sm:$0xff]  ;;  %v74_v3 = vld [vmem:[%s3316_s2 + $0x18] sm:$0xff] }
   0xd   :  { %2220 = vmatprep.subr.msk.mxu0 %vm109_vm0, %v76_v1  ;;  %v2745_v4 = vld [vmem:[%s3317_s4] sm:$0xff]  ;;  %v73_v7 = vld [vmem:[%s3316_s2 + $0x10] sm:$0xff]  ;;  %v72_v9 = vld [vmem:[%s3316_s2 + $0x8] sm:$0xff] }
   0xe   :  { %2221 = vmatpush3.msk.msra.mxu0 %vm109_vm0, %v76_v1  ;;  %v261_v5 = vld [vmem:[%s3318_s0 + $0x78] sm:$0xff]  ;;  %2232 = vmatprep.mubr.msk.f32.mxu0 %vm84_vm1, %v2745_v4  ;;  %v260_v6 = vld [vmem:[%s3318_s0 + $0x70] sm:$0xff]  ;;  %v259_v8 = vld [vmem:[%s3318_s0 + $0x68] sm:$0xff] }
   0xf   :  { %2222 = vmatprep.subr.mxu0 %v75_v2  ;;  %2244 = vmatprep.subr.mxu1 %v261_v5 }
  0x10   :  { %2223 = vmatpush3.msra.mxu0 %v75_v2  ;;  %2245 = vmatpush3.msra.mxu1 %v261_v5 }
  0x11   :  { %2224 = vmatprep.subr.mxu0 %v74_v3  ;;  %2246 = vmatprep.subr.mxu1 %v260_v6 }
  0x12   :  { %2225 = vmatpush3.msra.mxu0 %v74_v3 }
  0x13   :  { %28 = vsyncpa [#allocation4], 0  ;;  %2226 = vmatprep.subr.mxu0 %v73_v7  ;;  %2247 = vmatpush3.msra.mxu1 %v260_v6  ;;  %v258_v10 = vld [vmem:[%s3318_s0 + $0x60] sm:$0xff]  ;;  %v257_v12 = vld [vmem:[%s3318_s0 + $0x58] sm:$0xff]  ;;  %vm454_vm2 = vcmask 1043456   ;;  %v2614_v28 = vmov 0.0  }
  0x14   :  { %2227 = vmatpush3.msra.mxu0 %v73_v7  ;;  %v71_v11 = vld [vmem:[%s3316_s2] sm:$0xff]  ;;  %2248 = vmatprep.subr.mxu1 %v259_v8  ;;  %v2776_v13 = vld [vmem:[%s3317_s4 + $0x8] sm:$0xff]  ;;  %v256_v14 = vld [vmem:[%s3318_s0 + $0x50] sm:$0xff]  ;;  %vm2615_vm3 = vmmov 0   ;;  %vm450_vm4 = vcmask 162816   ;;  %s3319_s22 = sld [smem:[#allocation8_spill]] }
  0x15   :  { %2228 = vmatprep.subr.mxu0 %v72_v9  ;;  %2249 = vmatpush3.msra.mxu1 %v259_v8  ;;  %v255_v15 = vld [vmem:[%s3318_s0 + $0x48] sm:$0xff]  ;;  %v254_v16 = vld [vmem:[%s3318_s0 + $0x40] sm:$0xff]  ;;  %v253_v17 = vld [vmem:[%s3318_s0 + $0x38] sm:$0xff]  ;;  %s3320_s27 = sld [smem:[#allocation10_spill]]  ;;  %s2618_s3 = smov 32   ;;  %vm899_vm14 = vcmask 261120  }
  0x16   :  { %2229 = vmatpush3.msra.mxu0 %v72_v9  ;;  %2250 = vmatprep.subr.mxu1 %v258_v10  ;;  %v252_v18 = vld [vmem:[%s3318_s0 + $0x30] sm:$0xff]  ;;  %v251_v19 = vld [vmem:[%s3318_s0 + $0x28] sm:$0xff]  ;;  %v250_v20 = vld [vmem:[%s3318_s0 + $0x20] sm:$0xff] }
  0x17   :  { %2230 = vmatprep.subr.mxu0 %v71_v11  ;;  %2251 = vmatpush3.msra.mxu1 %v258_v10  ;;  %v249_v21 = vld [vmem:[%s3318_s0 + $0x18] sm:$0xff]  ;;  %v248_v22 = vld [vmem:[%s3318_s0 + $0x10] sm:$0xff]  ;;  %v247_v23 = vld [vmem:[%s3318_s0 + $0x8] sm:$0xff] }
  0x18   :  { %2231 = vmatpush3.msra.mxu0 %v71_v11  ;;  %2252 = vmatprep.subr.mxu1 %v257_v12  ;;  %v246_v24 = vld [vmem:[%s3318_s0] sm:$0xff]  ;;  %v2816_v25 = vld [vmem:[%s3317_s4 + $0x10] sm:$0xff]  ;;  %v2821_v26 = vld [vmem:[%s3317_s4 + $0x18] sm:$0xff] }
  0x19   :  { %2233 = vmatmul.mubr.msk.f32.vlgmr.msra.gmra.mxu0 %vm84_vm1, %v2776_v13  ;;  %2253 = vmatpush3.msra.mxu1 %v257_v12  ;;  %v2826_v27 = vld [vmem:[%s3317_s4 + $0x20] sm:$0xff]  ;;  %v449_v29 = vld [vmem:[%s3293_s6 + $0x10] sm:$0xf]  ;;  %v448_v30 = vld [vmem:[%s3293_s6 + $0x8] sm:$0xff] }
  0x1a   :  { %2254 = vmatprep.subr.mxu1 %v256_v14  ;;  %2235 = vmatprep.mubr.msk.f32.mxu0 %vm84_vm1, %v2816_v25  ;;  %v2844_v31 = vld [vmem:[%s3317_s4 + $0x28] sm:$0xff]  ;;  %v2850_v32 = vld [vmem:[%s3317_s4 + $0x30] sm:$0xff]  ;;  %v447_v33 = vld [vmem:[%s3293_s6] sm:$0xff] }
  0x1b   :  { %2255 = vmatpush3.msra.mxu1 %v256_v14  ;;  %2288 = vmatprep.subr.mxu0 %v2614_v28  ;;  %v2864_v34 = vld [vmem:[%s3317_s4 + $0x38] sm:$0xff]  ;;  %v446_v35 = vld [vmem:[%s3292_s5] sm:$0xff]  ;;  %v755_v1 = vld [vmem:[%s3297_s10 + $0x28] sm:$0x3] }
  0x1c   :  { %2256 = vmatprep.subr.mxu1 %v255_v15  ;;  %2289 = vmatpush3.msk.msra.mxu0 %vm454_vm2, %v449_v29  ;;  %v2022_v36 = vld [vmem:[%s3319_s22] ss:$0 sm:$0xff]  ;;  %v530_v2 = vld [vmem:[%s3294_s7 + $0x10] sm:$0xf]  ;;  %v529_v7 = vld [vmem:[%s3294_s7 + $0x8] sm:$0xff] }
  0x1d   :  { %2257 = vmatpush3.msra.mxu1 %v255_v15  ;;  %2236 = vmatmul.mubr.msk.f32.gmra.mxu0 %vm84_vm1, %v2821_v26  ;;  %v754_v3 = vld [vmem:[%s3297_s10 + $0x20] sm:$0xff]  ;;  %v753_v14 = vld [vmem:[%s3297_s10 + $0x18] sm:$0xff]  ;;  %v752_v15 = vld [vmem:[%s3297_s10 + $0x10] sm:$0xff] }
  0x1e   :  { %2258 = vmatprep.subr.mxu1 %v254_v16  ;;  %2238 = vmatprep.mubr.msk.f32.mxu0 %vm84_vm1, %v2826_v27  ;;  %v528_v11 = vld [vmem:[%s3294_s7] sm:$0xff] }
  0x1f   :  { %2259 = vmatpush3.msra.mxu1 %v254_v16  ;;  %2290 = vmatprep.subr.mxu0 %v2614_v28  ;;  %v751_v16 = vld [vmem:[%s3297_s10 + $0x8] sm:$0xff] }
  0x20   :  { %2260 = vmatprep.subr.mxu1 %v253_v17  ;;  %2291 = vmatpush3.msra.mxu0 %v448_v30 }
  0x21   :  { %2261 = vmatpush3.msra.mxu1 %v253_v17  ;;  %2239 = vmatmul.mubr.msk.f32.gmra.mxu0 %vm84_vm1, %v2844_v31  ;;  %v607_v17 = vld [vmem:[%s3295_s8] sm:$0x7] }
  0x22   :  { %2262 = vmatprep.subr.mxu1 %v252_v18  ;;  %2292 = vmatprep.subr.mxu0 %v2614_v28 }
  0x23   :  { %2263 = vmatpush3.msra.mxu1 %v252_v18  ;;  %2241 = vmatprep.mubr.msk.f32.mxu0 %vm84_vm1, %v2850_v32  ;;  %v2920_v18 = vld [vmem:[%s3298_s11 + $0x18] sm:$0xff] }
  0x24   :  { %2264 = vmatprep.subr.mxu1 %v251_v19  ;;  %2293 = vmatpush3.msra.mxu0 %v447_v33 }
  0x25   :  { %2265 = vmatpush3.msra.mxu1 %v251_v19  ;;  %2297 = vmatprep.subr.mxu0 %v2614_v28  ;;  %v750_v19 = vld [vmem:[%s3297_s10] sm:$0xff] }
  0x26   :  { %2266 = vmatprep.subr.mxu1 %v250_v20  ;;  %2242 = vmatmul.mubr.msk.f32.gmra.mxu0 %vm84_vm1, %v2864_v34 }
  0x27   :  { %2267 = vmatpush3.msra.mxu1 %v250_v20  ;;  %2294 = vmatprep.mubr.msk.f32.mxu0 %vm2615_vm3, %v2614_v28  ;;  %v2930_v20 = vld [vmem:[%s3298_s11 + $0x10] sm:$0xff] }
  0x28   :  { %2268 = vmatprep.subr.mxu1 %v249_v21 }
  0x29   :  { %2269 = vmatpush3.msra.mxu1 %v249_v21  ;;  %v2942_v21 = vld [vmem:[%s3298_s11 + $0x8] sm:$0xff] }
  0x2a   :  { %2270 = vmatprep.subr.mxu1 %v248_v22  ;;  %2295 = vmatmul.mubr.msk.f32.vlgmr.msra.gmra.mxu0 %vm450_vm4, %v446_v35 }
  0x2b   :  { %2271 = vmatpush3.msra.mxu1 %v248_v22  ;;  %2303 = vmatprep.mubr.msk.f32.mxu0 %vm2615_vm3, %v2614_v28  ;;  %v2949_v22 = vld [vmem:[%s3298_s11] sm:$0xff] }
  0x2c   :  { %2272 = vmatprep.subr.mxu1 %v247_v23  ;;  %2298 = vmatpush3.msk.msra.mxu0 %vm454_vm2, %v530_v2 }
  0x2d   :  { %2273 = vmatpush3.msra.mxu1 %v247_v23  ;;  %2299 = vmatprep.subr.mxu0 %v2614_v28  ;;  %v2032_v23 = vld [vmem:[%s3320_s27] ss:$0 sm:$0xff] }
  0x2e   :  { %2274 = vmatprep.subr.mxu1 %v246_v24  ;;  %2300 = vmatpush3.msra.mxu0 %v529_v7 }
  0x2f   :  { %2275 = vmatpush3.msra.mxu1 %v246_v24  ;;  %2301 = vmatprep.subr.mxu0 %v2614_v28 }
  0x30   :  { %2311 = vmatprep.subr.msk.mxu1 %vm109_vm0, %v755_v1  ;;  %2302 = vmatpush3.msra.mxu0 %v528_v11 }
  0x31   :  { %2306 = vmatprep.subr.mxu0 %v2614_v28 }
  0xd9   :  { %v2234_v37 = vpop.f32.mrf.mxu0 }
  0xda   :  { %v185_v38 = vadd.f32 %v2234_v37, %v2022_v36 }
  0xdb   :  { %v179_v39 = vpop.f32.mrf.mxu0 }
  0xdc   :  { %v180_v40 = vadd.f32 %v2022_v36, %v179_v39  ;;  %v227_v41 = vmul.f32 0.01, %v185_v38  ;;  %vm219_vm6 = vcmp.gt.f32.partialorder %v185_v38, 0.0 }
  0xdd   :  { %v2237_v45 = vpop.f32.mrf.mxu0 }
  0xde   :  { %vm218_vm5 = vcmp.gt.f32.partialorder %v180_v40, 0.0  ;;  %v226_v42 = vmul.f32 0.01, %v180_v40  ;;  %v235_v44 = vsel %vm219_vm6, %v185_v38, %v227_v41  ;;  %v195_v48 = vadd.f32 %v2237_v45, %v2022_v36 }
  0xdf   :  { %v189_v46 = vpop.f32.mrf.mxu0  ;;  %v242_v41 = vlaneseq  ;;  %vm1703_vm6 = vcmask 523520  }
  0xe0   :  { %v234_v43 = vsel %vm218_vm5, %v180_v40, %v226_v42  ;;  %v190_v47 = vadd.f32 %v2022_v36, %v189_v46  ;;  %v229_v51 = vmul.f32 0.01, %v195_v48  ;;  %vm221_vm8 = vcmp.gt.f32.partialorder %v195_v48, 0.0 }
  0xe1   :  { %2276 = vmatprep.mubr.f32.mxu1 %v234_v43  ;;  %v2240_v49 = vpop.f32.mrf.mxu0  ;;  %v243_v42 = vand.u32 127, %v242_v41  ;;  %v2616_v43 = vmov -1.0   ;;  %vm1987_vm5 = vcmask 7168  }
  0xe2   :  { %2277 = vmatmul.mubr.f32.vlgmr.msra.gmra.mxu1 %v235_v44  ;;  %v228_v50 = vmul.f32 0.01, %v190_v47  ;;  %vm220_vm7 = vcmp.gt.f32.partialorder %v190_v47, 0.0  ;;  %v205_v55 = vadd.f32 %v2240_v49, %v2022_v36  ;;  %v237_v57 = vsel %vm221_vm8, %v195_v48, %v229_v51 }
  0xe3   :  { %v199_v52 = vpop.f32.mrf.mxu0  ;;  %2312 = vmatpush3.msk.msra.mxu1 %vm109_vm0, %v755_v1  ;;  %vm244_vm13 = vcmp.lt.s32.totalorder %v243_v42, 25 }
  0xe4   :  { %v200_v53 = vadd.f32 %v2022_v36, %v199_v52  ;;  %v236_v54 = vsel %vm220_vm7, %v190_v47, %v228_v50  ;;  %v231_v59 = vmul.f32 0.01, %v205_v55  ;;  %vm223_vm10 = vcmp.gt.f32.partialorder %v205_v55, 0.0  ;;  %2313 = vmatprep.subr.mxu1 %v754_v3 }
  0xe5   :  { %2279 = vmatprep.mubr.f32.mxu1 %v236_v54  ;;  %2314 = vmatpush3.msra.mxu1 %v754_v3  ;;  %v2968_v44 = vsel %vm244_vm13, 1.0, %v2616_v43  ;;  %vm737_vm7 = vcmask 64512  }
  0xe6   :  { %v2243_v56 = vpop.f32.mrf.mxu0  ;;  %v230_v58 = vmul.f32 0.01, %v200_v53  ;;  %2280 = vmatmul.mubr.f32.gmra.mxu1 %v237_v57  ;;  %vm222_vm9 = vcmp.gt.f32.partialorder %v200_v53, 0.0  ;;  %v239_v0 = vsel %vm223_vm10, %v205_v55, %v231_v59  ;;  %2315 = vmatprep.subr.mxu1 %v753_v14 }
  0xe7   :  { %v215_v63 = vadd.f32 %v2243_v56, %v2022_v36  ;;  %2316 = vmatpush3.msra.mxu1 %v753_v14 }
  0xe8   :  { %v209_v60 = vpop.f32.mrf.mxu0  ;;  %v238_v62 = vsel %vm222_vm9, %v200_v53, %v230_v58  ;;  %2317 = vmatprep.subr.mxu1 %v752_v15 }
  0xe9   :  { %v210_v61 = vadd.f32 %v2022_v36, %v209_v60  ;;  %2282 = vmatprep.mubr.f32.mxu1 %v238_v62  ;;  %v233_v8 = vmul.f32 0.01, %v215_v63  ;;  %vm225_vm12 = vcmp.gt.f32.partialorder %v215_v63, 0.0  ;;  %2318 = vmatpush3.msra.mxu1 %v752_v15 }
  0xea   :  { %v524_v5 = vpop.f32.mrf.mxu0  ;;  %2283 = vmatmul.mubr.f32.gmra.mxu1 %v239_v0  ;;  %2319 = vmatprep.subr.mxu1 %v751_v16 }
  0xeb   :  { %v232_v6 = vmul.f32 0.01, %v210_v61  ;;  %vm224_vm11 = vcmp.gt.f32.partialorder %v210_v61, 0.0  ;;  %v241_v12 = vsel %vm225_vm12, %v215_v63, %v233_v8  ;;  %2304 = vmatmul.mubr.msk.f32.vlgmr.msra.gmra.mxu0 %vm450_vm4, %v524_v5  ;;  %2320 = vmatpush3.msra.mxu1 %v751_v16 }
  0xec   :  { %v2296_v9 = vpop.f32.mrf.mxu0  ;;  %2307 = vmatpush3.xpose.msk.msra.mxu0 %vm450_vm4, %v524_v5  ;;  %2308 = vmatprep.mubr.msk.f32.mxu0 %vm2615_vm3, %v2614_v28 }
  0xed   :  { %v240_v10 = vsel %vm224_vm11, %v210_v61, %v232_v6  ;;  %2335 = vmatprep.subr.mxu0 %v2614_v28  ;;  %2321 = vmatprep.subr.mxu1 %v750_v19 }
  0xee   :  { %2285 = vmatprep.mubr.f32.mxu1 %v240_v10  ;;  %2322 = vmatpush3.msra.mxu1 %v750_v19 }
  0xef   :  { %2286 = vmatmul.mubr.f32.gmra.mxu1 %v241_v12  ;;  %2309 = vmatmul.mubr.msk.f32.vlgmr.msra.gmra.mxu0 %vm450_vm4, %v607_v17 }
  0xf0   :  { %2336 = vmatpush3.msra.mxu0 %v2920_v18  ;;  %2343 = vmatprep.mubr.msk.f32.mxu0 %vm2615_vm3, %v2614_v28 }
  0xf1   :  { %2337 = vmatprep.subr.mxu0 %v2614_v28  ;;  %2368 = vmatprep.subr.mxu1 %v2614_v28 }
  0xf2   :  { %2338 = vmatpush3.msra.mxu0 %v2930_v20 }
  0xf3   :  { %2339 = vmatprep.subr.mxu0 %v2614_v28 }
  0xf4   :  { %2340 = vmatpush3.msra.mxu0 %v2942_v21 }
  0xf5   :  { %2341 = vmatprep.subr.mxu0 %v2614_v28 }
  0xf6   :  { %2342 = vmatpush3.msra.mxu0 %v2949_v22 }
  0xf7   :  { %2344 = vmatmul.mubr.f32.vlgmr.msra.gmra.mxu0 %v2614_v28  ;;  %2346 = vmatprep.subr.mxu0 %v2614_v28 }
  0xf8   :  { %2347 = vmatpush3.msra.mxu0 %v2920_v18  ;;  %2354 = vmatprep.mubr.msk.f32.mxu0 %vm2615_vm3, %v2614_v28 }
  0xf9   :  { %2348 = vmatprep.subr.mxu0 %v2614_v28 }
  0xfa   :  { %2349 = vmatpush3.msra.mxu0 %v2930_v20 }
  0xfb   :  { %2350 = vmatprep.subr.mxu0 %v2614_v28 }
  0xfc   :  { %2351 = vmatpush3.msra.mxu0 %v2942_v21 }
  0xfd   :  { %2352 = vmatprep.subr.mxu0 %v2614_v28 }
  0xfe   :  { %2353 = vmatpush3.msra.mxu0 %v2949_v22 }
  0xff   :  { %2357 = vmatprep.subr.mxu0 %v2614_v28 }
 0x1a2   :  { %v2278_v24 = vpop.f32.mrf.mxu1 }
 0x1a3   :  { %v341_v29 = vadd.f32 %v2278_v24, %v2032_v23 }
 0x1a4   :  { %v335_v30 = vpop.f32.mrf.mxu1 }
 0x1a5   :  { %v2034_v33 = vmul.f32 -1.442695, %v341_v29  ;;  %v336_v35 = vadd.f32 %v2032_v23, %v335_v30 }
 0x1a7   :  { %2476 = vpow2.f32 %v2034_v33  ;;  %v2033_v36 = vmul.f32 -1.442695, %v336_v35 }
 0x1a9   :  { %2478 = vpow2.f32 %v2033_v36 }
 0x1ab   :  { %v2992_v2 = vpop.f32.mrf.mxu0 }
 0x1ad   :  { %v2305_v5 = vpop.f32.mrf.mxu0 }
 0x1af   :  { %v2994_v6 = vpop.f32.mrf.mxu0 }
 0x1b1   :  { %v2310_v7 = vpop.f32.mrf.mxu0 }
 0x1b4   :  { %v2477_v37 = vpop.eup %2476 }
 0x1b5   :  { %v399_v38 = vadd.f32 1.0, %v2477_v37 }
 0x1b6   :  { %v2479_v39 = vpop.eup %2478 }
 0x1b7   :  { %2480 = vrcp.f32 %v399_v38  ;;  %v398_v40 = vadd.f32 1.0, %v2479_v39  ;;  %v969_v16 = vpop.f32.mrf.mxu0 }
 0x1b9   :  { %2482 = vrcp.f32 %v398_v40 }
 0x1c4   :  { %v2481_v45 = vpop.eup %2480 }
 0x1c5   :  { %v423_v46 = vmul.f32 %v2481_v45, %v2968_v44 }
 0x1c6   :  { %v2483_v47 = vpop.eup %2482 }
 0x1c7   :  { %v422_v48 = vmul.f32 %v2483_v47, %v2968_v44  ;;  %431 = vst.msk [vmem:[%s3306_s19 + $0x8] sm:$0xff] %vm84_vm1, %v423_v46  ;;  %v439_v50 = vmul.f32 %v423_v46, %v2776_v13 }
 0x1c9   :  { %430 = vst.msk [vmem:[%s3306_s19] sm:$0xff] %vm84_vm1, %v422_v48  ;;  %v438_v49 = vmul.f32 %v422_v48, %v2745_v4  ;;  %v2281_v4 = vpop.f32.mrf.mxu1 }
 0x1ca   :  { %v351_v13 = vadd.f32 %v2281_v4, %v2032_v23 }
 0x1cb   :  { %2323 = vmatprep.mubr.msk.f32.mxu1 %vm84_vm1, %v438_v49  ;;  %v345_v51 = vpop.f32.mrf.mxu1 }
 0x1cc   :  { %2324 = vmatmul.mubr.msk.f32.vlgmr.msra.gmra.mxu1 %vm84_vm1, %v439_v50  ;;  %v2036_v52 = vmul.f32 -1.442695, %v351_v13  ;;  %v346_v53 = vadd.f32 %v2032_v23, %v345_v51  ;;  %v3043_v50 = vld [vmem:[%s3299_s12] ss:$0 sm:$0xff] }
 0x1cd   :  { %2369 = vmatpush3.msra.mxu1 %v2920_v18  ;;  %v2284_v54 = vpop.f32.mrf.mxu1 }
 0x1ce   :  { %2370 = vmatprep.subr.mxu1 %v2614_v28  ;;  %2484 = vpow2.f32 %v2036_v52  ;;  %v2035_v55 = vmul.f32 -1.442695, %v346_v53  ;;  %v361_v56 = vadd.f32 %v2284_v54, %v2032_v23 }
 0x1cf   :  { %2371 = vmatpush3.msra.mxu1 %v2930_v20  ;;  %v355_v57 = vpop.f32.mrf.mxu1 }
 0x1d0   :  { %2372 = vmatprep.subr.mxu1 %v2614_v28  ;;  %2486 = vpow2.f32 %v2035_v55  ;;  %v2038_v58 = vmul.f32 -1.442695, %v361_v56  ;;  %v356_v59 = vadd.f32 %v2032_v23, %v355_v57 }
 0x1d1   :  { %2373 = vmatpush3.msra.mxu1 %v2942_v21  ;;  %v2287_v60 = vpop.f32.mrf.mxu1 }
 0x1d2   :  { %2374 = vmatprep.subr.mxu1 %v2614_v28  ;;  %2488 = vpow2.f32 %v2038_v58  ;;  %v2037_v61 = vmul.f32 -1.442695, %v356_v59  ;;  %v371_v62 = vadd.f32 %v2287_v60, %v2032_v23 }
 0x1d3   :  { %2375 = vmatpush3.msra.mxu1 %v2949_v22  ;;  %v365_v63 = vpop.f32.mrf.mxu1 }
 0x1d4   :  { %2390 = vmatprep.subr.mxu1 %v2614_v28  ;;  %2490 = vpow2.f32 %v2037_v61  ;;  %v2040_v0 = vmul.f32 -1.442695, %v371_v62  ;;  %v366_v1 = vadd.f32 %v2032_v23, %v365_v63  ;;  %v2345_v23 = vpop.f32.mrf.mxu0 }
 0x1d6   :  { %2492 = vpow2.f32 %v2040_v0  ;;  %v2039_v3 = vmul.f32 -1.442695, %v366_v1 }
 0x1d8   :  { %2494 = vpow2.f32 %v2039_v3 }
 0x1db   :  { %v2485_v8 = vpop.eup %2484 }
 0x1dc   :  { %v401_v9 = vadd.f32 1.0, %v2485_v8 }
 0x1dd   :  { %v2487_v10 = vpop.eup %2486 }
 0x1de   :  { %v400_v11 = vadd.f32 1.0, %v2487_v10  ;;  %2496 = vrcp.f32 %v401_v9 }
 0x1df   :  { %v2489_v12 = vpop.eup %2488 }
 0x1e0   :  { %2498 = vrcp.f32 %v400_v11  ;;  %v403_v14 = vadd.f32 1.0, %v2489_v12 }
 0x1e1   :  { %v2491_v15 = vpop.eup %2490 }
 0x1e2   :  { %v402_v17 = vadd.f32 1.0, %v2491_v15  ;;  %2500 = vrcp.f32 %v403_v14 }
 0x1e3   :  { %v2493_v19 = vpop.eup %2492 }
 0x1e4   :  { %2502 = vrcp.f32 %v402_v17  ;;  %v405_v24 = vadd.f32 1.0, %v2493_v19 }
 0x1e5   :  { %v2495_v29 = vpop.eup %2494 }
 0x1e6   :  { %v404_v30 = vadd.f32 1.0, %v2495_v29  ;;  %2504 = vrcp.f32 %v405_v24 }
 0x1e8   :  { %2506 = vrcp.f32 %v404_v30 }
 0x1eb   :  { %v2497_v33 = vpop.eup %2496 }
 0x1ec   :  { %v425_v37 = vmul.f32 %v2497_v33, %v2968_v44 }
 0x1ed   :  { %v2499_v35 = vpop.eup %2498 }
 0x1ee   :  { %v424_v36 = vmul.f32 %v2499_v35, %v2968_v44  ;;  %433 = vst.msk [vmem:[%s3306_s19 + $0x18] sm:$0xff] %vm84_vm1, %v425_v37  ;;  %v441_v42 = vmul.f32 %v425_v37, %v2821_v26 }
 0x1ef   :  { %v2501_v38 = vpop.eup %2500 }
 0x1f0   :  { %432 = vst.msk [vmem:[%s3306_s19 + $0x10] sm:$0xff] %vm84_vm1, %v424_v36  ;;  %v440_v39 = vmul.f32 %v424_v36, %v2816_v25  ;;  %v427_v45 = vmul.f32 %v2501_v38, %v2968_v44 }
 0x1f1   :  { %v2503_v40 = vpop.eup %2502 }
 0x1f2   :  { %2326 = vmatprep.mubr.msk.f32.mxu1 %vm84_vm1, %v440_v39  ;;  %v426_v43 = vmul.f32 %v2503_v40, %v2968_v44  ;;  %435 = vst.msk [vmem:[%s3306_s19 + $0x28] sm:$0xff] %vm84_vm1, %v427_v45  ;;  %v443_v26 = vmul.f32 %v427_v45, %v2844_v31 }
 0x1f3   :  { %2327 = vmatmul.mubr.msk.f32.gmra.mxu1 %vm84_vm1, %v441_v42  ;;  %v2505_v46 = vpop.eup %2504 }
 0x1f4   :  { %434 = vst.msk [vmem:[%s3306_s19 + $0x20] sm:$0xff] %vm84_vm1, %v426_v43  ;;  %v442_v25 = vmul.f32 %v426_v43, %v2826_v27  ;;  %v429_v49 = vmul.f32 %v2505_v46, %v2968_v44 }
 0x1f5   :  { %v2507_v47 = vpop.eup %2506 }
 0x1f6   :  { %2329 = vmatprep.mubr.msk.f32.mxu1 %vm84_vm1, %v442_v25  ;;  %v428_v48 = vmul.f32 %v2507_v47, %v2968_v44  ;;  %437 = vst.msk [vmem:[%s3306_s19 + $0x38] sm:$0xff] %vm84_vm1, %v429_v49  ;;  %v445_v31 = vmul.f32 %v429_v49, %v2864_v34 }
 0x1f7   :  { %2330 = vmatmul.mubr.msk.f32.gmra.mxu1 %vm84_vm1, %v443_v26 }
 0x1f8   :  { %436 = vst.msk [vmem:[%s3306_s19 + $0x30] sm:$0xff] %vm84_vm1, %v428_v48  ;;  %v444_v27 = vmul.f32 %v428_v48, %v2850_v32  ;;  %s2617_s19 = smov 64  }
 0x1fa   :  { %2332 = vmatprep.mubr.msk.f32.mxu1 %vm84_vm1, %v444_v27 }
 0x1fb   :  { %2333 = vmatmul.mubr.msk.f32.gmra.mxu1 %vm84_vm1, %v445_v31 }
 0x1fc   :  { %2376 = vmatprep.mubr.msk.f32.mxu1 %vm2615_vm3, %v2614_v28 }
 0x28c   :  { %v2325_v44 = vpop.f32.mrf.mxu1 }
 0x28d   :  { %v862_v0 = vadd.f32 %v2325_v44, %v3043_v50 }
 0x28e   :  { %v856_v32 = vpop.f32.mrf.mxu1 }
 0x28f   :  { %v857_v4 = vadd.f32 %v3043_v50, %v856_v32 }
 0x291   :  { %v973_v13 = vadd.f32 %v969_v16, %v857_v4 }
 0x293   :  { %2508 = vtanh.f32 %v973_v13  ;;  %v2061_v34 = vmul.f32 -1.442695, %v973_v13 }
 0x295   :  { %2510 = vpow2.f32 %v2061_v34 }
 0x2a0   :  { %v2509_v51 = vpop.eup %2508 }
 0x2a1   :  { %983 = vrot.lane.b32.xlu0 %v2509_v51, %s2617_s19 }
 0x2a2   :  { %v2511_v52 = vpop.eup %2510 }
 0x2a3   :  { %v977_v53 = vadd.f32 1.0, %v2511_v52 }
 0x2a5   :  { %2512 = vrcp.f32 %v977_v53 }
 0x2b2   :  { %v2513_v54 = vpop.eup %2512 }
 0x2b3   :  { %v981_v57 = vmul.f32 0.0, %v2513_v54  ;;  %v2328_v30 = vpop.f32.mrf.mxu1 }
 0x2b4   :  { %v872_v34 = vadd.f32 %v2328_v30, %v3043_v50 }
 0x2b5   :  { %v866_v33 = vpop.f32.mrf.mxu1 }
 0x2b6   :  { %v867_v35 = vadd.f32 %v3043_v50, %v866_v33 }
 0x2b7   :  { %v3102_v32 = vpop.f32.mrf.mxu1 }
 0x2b9   :  { %v876_v4 = vpop.f32.mrf.mxu1 }
 0x2bb   :  { %v3104_v13 = vpop.f32.mrf.mxu1 }
 0x2bd   :  { %v3106_v51 = vpop.f32.mrf.mxu1 }
 0x313   :  { %v984_v55 = vpop.permute.xlu0 %983 }
 0x314   :  { %v986_v56 = vmul.f32 %v2513_v54, %v984_v55 }
 0x316   :  { %988 = vrot.lane.b32.xlu0 %v986_v56, %s2618_s3 }
 0x388   :  { %v989_v58 = vpop.permute.xlu0 %988 }
 0x389   :  { %v991_v59 = vadd.f32 %v989_v58, %v981_v57 }
 0x38b   :  { %2514 = vtanh.f32 %v991_v59 }
 0x398   :  { %v2515_v60 = vpop.eup %2514 }
 0x399   :  { %994 = vrot.lane.b32.xlu1 %v2515_v60, %s2617_s19 }
 0x40b   :  { %v995_v61 = vpop.permute.xlu1 %994 }
 0x40c   :  { %v997_v62 = vmul.f32 %v2513_v54, %v995_v61 }
 0x40e   :  { %999 = vrot.lane.b32.xlu1 %v997_v62, %s2618_s3 }
 0x480   :  { %v3050_v63 = vpop.permute.xlu1 %999 }
 0x481   :  { %2355 = vmatmul.mubr.msk.f32.vlgmr.msra.gmra.mxu0 %vm899_vm14, %v3050_v63 }
 0x482   :  { %2358 = vmatpush3.msra.mxu0 %v2920_v18  ;;  %2365 = vmatprep.mubr.msk.f32.mxu0 %vm2615_vm3, %v2614_v28 }
 0x483   :  { %2359 = vmatprep.subr.mxu0 %v2614_v28 }
 0x484   :  { %2360 = vmatpush3.msra.mxu0 %v2930_v20 }
 0x485   :  { %2361 = vmatprep.subr.mxu0 %v2614_v28 }
 0x486   :  { %2362 = vmatpush3.msra.mxu0 %v2942_v21 }
 0x487   :  { %2363 = vmatprep.subr.mxu0 %v2614_v28 }
 0x488   :  { %2364 = vmatpush3.msra.mxu0 %v2949_v22 }
 0x489   :  { %2379 = vmatprep.subr.mxu0 %v2614_v28 }
 0x541   :  { %v1069_v1 = vpop.f32.mrf.mxu0 }
 0x542   :  { %v1073_v3 = vadd.f32 %v1069_v1, %v862_v0 }
 0x543   :  { %v2356_v5 = vpop.f32.mrf.mxu0 }
 0x544   :  { %2516 = vtanh.f32 %v1073_v3  ;;  %v2063_v8 = vmul.f32 -1.442695, %v1073_v3 }
 0x546   :  { %2518 = vpow2.f32 %v2063_v8 }
 0x551   :  { %v2517_v7 = vpop.eup %2516 }
 0x552   :  { %1083 = vrot.lane.b32.xlu0 %v2517_v7, %s2617_s19 }
 0x553   :  { %v2519_v9 = vpop.eup %2518 }
 0x554   :  { %v1077_v10 = vadd.f32 1.0, %v2519_v9  ;;  %v877_v9 = vadd.f32 %v3043_v50, %v876_v4 }
 0x556   :  { %2520 = vrcp.f32 %v1077_v10 }
 0x563   :  { %v2521_v11 = vpop.eup %2520 }
 0x564   :  { %v1081_v15 = vmul.f32 %v2521_v11, %v991_v59 }
 0x5c4   :  { %v1084_v12 = vpop.permute.xlu0 %1083 }
 0x5c5   :  { %v1086_v14 = vmul.f32 %v2521_v11, %v1084_v12 }
 0x5c7   :  { %1088 = vrot.lane.b32.xlu1 %v1086_v14, %s2618_s3 }
 0x639   :  { %v1089_v16 = vpop.permute.xlu1 %1088 }
 0x63a   :  { %v1091_v17 = vadd.f32 %v1089_v16, %v1081_v15 }
 0x63c   :  { %2522 = vtanh.f32 %v1091_v17 }
 0x649   :  { %v2523_v19 = vpop.eup %2522 }
 0x64a   :  { %1094 = vrot.lane.b32.xlu0 %v2523_v19, %s2617_s19 }
 0x6bc   :  { %v1095_v23 = vpop.permute.xlu0 %1094 }
 0x6bd   :  { %v1097_v24 = vmul.f32 %v2521_v11, %v1095_v23 }
 0x6bf   :  { %1099 = vrot.lane.b32.xlu1 %v1097_v24, %s2618_s3 }
 0x731   :  { %v3069_v29 = vpop.permute.xlu1 %1099 }
 0x732   :  { %2366 = vmatmul.mubr.msk.f32.vlgmr.msra.gmra.mxu0 %vm899_vm14, %v3069_v29 }
 0x733   :  { %2380 = vmatpush3.msra.mxu0 %v2920_v18  ;;  %2387 = vmatprep.mubr.msk.f32.mxu0 %vm2615_vm3, %v2614_v28 }
 0x734   :  { %2381 = vmatprep.subr.mxu0 %v2614_v28 }
 0x735   :  { %2382 = vmatpush3.msra.mxu0 %v2930_v20 }
 0x736   :  { %2383 = vmatprep.subr.mxu0 %v2614_v28 }
 0x737   :  { %2384 = vmatpush3.msra.mxu0 %v2942_v21 }
 0x738   :  { %2385 = vmatprep.subr.mxu0 %v2614_v28 }
 0x739   :  { %2386 = vmatpush3.msra.mxu0 %v2949_v22 }
 0x73a   :  { %2401 = vmatprep.subr.mxu0 %v2614_v28 }
 0x7f2   :  { %v1169_v36 = vpop.f32.mrf.mxu0 }
 0x7f3   :  { %v1173_v37 = vadd.f32 %v1169_v36, %v867_v35 }
 0x7f4   :  { %v2367_v38 = vpop.f32.mrf.mxu0 }
 0x7f5   :  { %2524 = vtanh.f32 %v1173_v37  ;;  %v2065_v40 = vmul.f32 -1.442695, %v1173_v37 }
 0x7f7   :  { %2526 = vpow2.f32 %v2065_v40  ;;  %v882_v40 = vadd.f32 %v3102_v32, %v3043_v50 }
 0x802   :  { %v2525_v39 = vpop.eup %2524 }
 0x803   :  { %1183 = vrot.lane.b32.xlu0 %v2525_v39, %s2617_s19 }
 0x804   :  { %v2527_v42 = vpop.eup %2526 }
 0x805   :  { %v1177_v43 = vadd.f32 1.0, %v2527_v42 }
 0x807   :  { %2528 = vrcp.f32 %v1177_v43 }
 0x814   :  { %v2529_v45 = vpop.eup %2528 }
 0x815   :  { %v1181_v47 = vmul.f32 %v2529_v45, %v1091_v17 }
 0x875   :  { %v1184_v46 = vpop.permute.xlu0 %1183 }
 0x876   :  { %v1186_v25 = vmul.f32 %v2529_v45, %v1184_v46 }
 0x878   :  { %1188 = vrot.lane.b32.xlu1 %v1186_v25, %s2618_s3 }
 0x8ea   :  { %v1189_v26 = vpop.permute.xlu1 %1188 }
 0x8eb   :  { %v1191_v48 = vadd.f32 %v1189_v26, %v1181_v47 }
 0x8ed   :  { %2530 = vtanh.f32 %v1191_v48 }
 0x8fa   :  { %v2531_v49 = vpop.eup %2530 }
 0x8fb   :  { %1194 = vrot.lane.b32.xlu0 %v2531_v49, %s2617_s19  ;;  %v1708_v49 = vld [vmem:[%s3300_s13 + $0x18] sm:$0xff] }
 0x96d   :  { %v1195_v27 = vpop.permute.xlu0 %1194 }
 0x96e   :  { %v1197_v31 = vmul.f32 %v2529_v45, %v1195_v27 }
 0x970   :  { %1199 = vrot.lane.b32.xlu1 %v1197_v31, %s2618_s3 }
 0x9e2   :  { %v3088_v44 = vpop.permute.xlu1 %1199 }
 0x9e3   :  { %2377 = vmatmul.mubr.msk.f32.vlgmr.msra.gmra.mxu1 %vm899_vm14, %v3088_v44 }
 0x9e4   :  { %2391 = vmatpush3.msra.mxu1 %v2920_v18  ;;  %2398 = vmatprep.mubr.msk.f32.mxu1 %vm2615_vm3, %v2614_v28 }
 0x9e5   :  { %2392 = vmatprep.subr.mxu1 %v2614_v28 }
 0x9e6   :  { %2393 = vmatpush3.msra.mxu1 %v2930_v20 }
 0x9e7   :  { %2394 = vmatprep.subr.mxu1 %v2614_v28 }
 0x9e8   :  { %2395 = vmatpush3.msra.mxu1 %v2942_v21 }
 0x9e9   :  { %2396 = vmatprep.subr.mxu1 %v2614_v28 }
 0x9ea   :  { %2397 = vmatpush3.msra.mxu1 %v2949_v22 }
 0x9eb   :  { %2412 = vmatprep.subr.mxu1 %v2614_v28 }
 0xaa3   :  { %v1269_v52 = vpop.f32.mrf.mxu1 }
 0xaa4   :  { %v1273_v53 = vadd.f32 %v1269_v52, %v872_v34  ;;  %v1707_v34 = vld [vmem:[%s3300_s13 + $0x10] sm:$0xff]  ;;  %v1706_v52 = vld [vmem:[%s3300_s13 + $0x8] sm:$0xff] }
 0xaa5   :  { %v2378_v54 = vpop.f32.mrf.mxu1 }
 0xaa6   :  { %2532 = vtanh.f32 %v1273_v53  ;;  %v2067_v56 = vmul.f32 -1.442695, %v1273_v53  ;;  %v1705_v53 = vld [vmem:[%s3300_s13] sm:$0xff] }
 0xaa8   :  { %2534 = vpow2.f32 %v2067_v56 }
 0xab3   :  { %v2533_v55 = vpop.eup %2532 }
 0xab4   :  { %1283 = vrot.lane.b32.xlu0 %v2533_v55, %s2617_s19 }
 0xab5   :  { %v2535_v57 = vpop.eup %2534 }
 0xab6   :  { %v1277_v58 = vadd.f32 1.0, %v2535_v57 }
 0xab8   :  { %2536 = vrcp.f32 %v1277_v58 }
 0xac5   :  { %v2537_v59 = vpop.eup %2536 }
 0xac6   :  { %v1281_v62 = vmul.f32 %v2537_v59, %v1191_v48 }
 0xb26   :  { %v1284_v60 = vpop.permute.xlu0 %1283 }
 0xb27   :  { %v1286_v61 = vmul.f32 %v2537_v59, %v1284_v60 }
 0xb29   :  { %1288 = vrot.lane.b32.xlu1 %v1286_v61, %s2618_s3 }
 0xb9b   :  { %v1289_v0 = vpop.permute.xlu1 %1288 }
 0xb9c   :  { %v1291_v1 = vadd.f32 %v1289_v0, %v1281_v62 }
 0xb9e   :  { %2538 = vtanh.f32 %v1291_v1 }
 0xbab   :  { %v2539_v3 = vpop.eup %2538 }
 0xbac   :  { %1294 = vrot.lane.b32.xlu0 %v2539_v3, %s2617_s19 }
 0xc1e   :  { %v1295_v5 = vpop.permute.xlu0 %1294 }
 0xc1f   :  { %v1297_v7 = vmul.f32 %v2537_v59, %v1295_v5 }
 0xc21   :  { %1299 = vrot.lane.b32.xlu1 %v1297_v7, %s2618_s3 }
 0xc93   :  { %v3113_v8 = vpop.permute.xlu1 %1299 }
 0xc94   :  { %2388 = vmatmul.mubr.msk.f32.vlgmr.msra.gmra.mxu0 %vm899_vm14, %v3113_v8 }
 0xc95   :  { %2402 = vmatpush3.msra.mxu0 %v2920_v18  ;;  %2409 = vmatprep.mubr.msk.f32.mxu0 %vm2615_vm3, %v2614_v28 }
 0xc96   :  { %2403 = vmatprep.subr.mxu0 %v2614_v28 }
 0xc97   :  { %2404 = vmatpush3.msra.mxu0 %v2930_v20 }
 0xc98   :  { %2405 = vmatprep.subr.mxu0 %v2614_v28 }
 0xc99   :  { %2406 = vmatpush3.msra.mxu0 %v2942_v21 }
 0xc9a   :  { %2407 = vmatprep.subr.mxu0 %v2614_v28 }
 0xc9b   :  { %2408 = vmatpush3.msra.mxu0 %v2949_v22 }
 0xc9c   :  { %2423 = vmatprep.subr.mxu0 %v1708_v49 }
 0xd54   :  { %v1369_v10 = vpop.f32.mrf.mxu0 }
 0xd55   :  { %v1373_v11 = vadd.f32 %v1369_v10, %v877_v9 }
 0xd56   :  { %v2389_v12 = vpop.f32.mrf.mxu0 }
 0xd57   :  { %2540 = vtanh.f32 %v1373_v11  ;;  %v2069_v15 = vmul.f32 -1.442695, %v1373_v11  ;;  %v3185_v11 = vld [vmem:[%s3301_s14] ss:$0 sm:$0xff] }
 0xd59   :  { %2542 = vpow2.f32 %v2069_v15 }
 0xd64   :  { %v2541_v14 = vpop.eup %2540 }
 0xd65   :  { %1383 = vrot.lane.b32.xlu0 %v2541_v14, %s2617_s19 }
 0xd66   :  { %v2543_v16 = vpop.eup %2542 }
 0xd67   :  { %v1377_v17 = vadd.f32 1.0, %v2543_v16 }
 0xd69   :  { %2544 = vrcp.f32 %v1377_v17 }
 0xd76   :  { %v2545_v19 = vpop.eup %2544 }
 0xd77   :  { %v1381_v30 = vmul.f32 %v2545_v19, %v1291_v1  ;;  %v1850_v1 = vld [vmem:[%s3302_s15 + $0x18] sm:$0xff] }
 0xdd7   :  { %v1384_v23 = vpop.permute.xlu0 %1383 }
 0xdd8   :  { %v1386_v24 = vmul.f32 %v2545_v19, %v1384_v23  ;;  %v1849_v23 = vld [vmem:[%s3302_s15 + $0x10] sm:$0xff] }
 0xdda   :  { %1388 = vrot.lane.b32.xlu1 %v1386_v24, %s2618_s3 }
 0xe4c   :  { %v1389_v33 = vpop.permute.xlu1 %1388 }
 0xe4d   :  { %v1391_v35 = vadd.f32 %v1389_v33, %v1381_v30 }
 0xe4f   :  { %2546 = vtanh.f32 %v1391_v35 }
 0xe5c   :  { %v2547_v36 = vpop.eup %2546 }
 0xe5d   :  { %1394 = vrot.lane.b32.xlu0 %v2547_v36, %s2617_s19 }
 0xecf   :  { %v1395_v37 = vpop.permute.xlu0 %1394 }
 0xed0   :  { %v1397_v38 = vmul.f32 %v2545_v19, %v1395_v37 }
 0xed2   :  { %1399 = vrot.lane.b32.xlu1 %v1397_v38, %s2618_s3  ;;  %v1847_v38 = vld [vmem:[%s3302_s15] sm:$0xff] }
 0xf44   :  { %v1400_v39 = vpop.permute.xlu1 %1399 }
 0xf45   :  { %2399 = vmatmul.mubr.msk.f32.vlgmr.msra.gmra.mxu1 %vm899_vm14, %v1400_v39 }
 0xf46   :  { %2413 = vmatpush3.msra.mxu1 %v2920_v18  ;;  %2420 = vmatprep.mubr.msk.f32.mxu1 %vm2615_vm3, %v2614_v28 }
 0xf47   :  { %2414 = vmatprep.subr.mxu1 %v2614_v28 }
 0xf48   :  { %2415 = vmatpush3.msra.mxu1 %v2930_v20 }
 0xf49   :  { %2416 = vmatprep.subr.mxu1 %v2614_v28 }
 0xf4a   :  { %2417 = vmatpush3.msra.mxu1 %v2942_v21 }
 0xf4b   :  { %2418 = vmatprep.subr.mxu1 %v2614_v28 }
 0xf4c   :  { %2419 = vmatpush3.msra.mxu1 %v2949_v22 }
 0xf4d   :  { %2443 = vmatprep.subr.mxu1 %v1850_v1 }
0x1005   :  { %v1469_v42 = vpop.f32.mrf.mxu1 }
0x1006   :  { %v1473_v18 = vadd.f32 %v1469_v42, %v882_v40 }
0x1007   :  { %v2400_v43 = vpop.f32.mrf.mxu1 }
0x1008   :  { %2548 = vtanh.f32 %v1473_v18  ;;  %v2071_v46 = vmul.f32 -1.442695, %v1473_v18 }
0x100a   :  { %2550 = vpow2.f32 %v2071_v46 }
0x1015   :  { %v2549_v45 = vpop.eup %2548 }
0x1016   :  { %1483 = vrot.lane.b32.xlu0 %v2549_v45, %s2617_s19 }
0x1017   :  { %v2551_v20 = vpop.eup %2550 }
0x1018   :  { %v1477_v25 = vadd.f32 1.0, %v2551_v20 }
0x101a   :  { %2552 = vrcp.f32 %v1477_v25 }
0x1027   :  { %v2553_v21 = vpop.eup %2552 }
0x1028   :  { %v1481_v22 = vmul.f32 %v2553_v21, %v1391_v35  ;;  %v1848_v35 = vld [vmem:[%s3302_s15 + $0x8] sm:$0xff] }
0x1088   :  { %v1484_v47 = vpop.permute.xlu0 %1483 }
0x1089   :  { %v1486_v28 = vmul.f32 %v2553_v21, %v1484_v47 }
0x108b   :  { %1488 = vrot.lane.b32.xlu1 %v1486_v28, %s2618_s3  ;;  %v892_v28 = vadd.f32 %v3104_v13, %v3043_v50 }
0x10fd   :  { %v1489_v26 = vpop.permute.xlu1 %1488 }
0x10fe   :  { %v1491_v48 = vadd.f32 %v1489_v26, %v1481_v22 }
0x1100   :  { %2554 = vtanh.f32 %v1491_v48 }
0x110d   :  { %v2555_v27 = vpop.eup %2554 }
0x110e   :  { %1494 = vrot.lane.b32.xlu0 %v2555_v27, %s2617_s19 }
0x1180   :  { %v1495_v31 = vpop.permute.xlu0 %1494 }
0x1181   :  { %v1497_v32 = vmul.f32 %v2553_v21, %v1495_v31 }
0x1183   :  { %1499 = vrot.lane.b32.xlu1 %v1497_v32, %s2618_s3 }
0x11f5   :  { %v1500_v4 = vpop.permute.xlu1 %1499 }
0x11f6   :  { %2410 = vmatmul.mubr.msk.f32.vlgmr.msra.gmra.mxu0 %vm899_vm14, %v1500_v4 }
0x11f7   :  { %2424 = vmatpush3.msra.mxu0 %v1708_v49  ;;  %2431 = vmatprep.mubr.msk.f32.mxu0 %vm899_vm14, %v3050_v63  ;;  %v887_v63 = vadd.f32 %v3043_v50, %v3106_v51  ;;  %v3212_v49 = vld [vmem:[#allocation2] ss:$0 sm:$0xff] }
0x11f8   :  { %2425 = vmatprep.subr.mxu0 %v1707_v34 }
0x11f9   :  { %2426 = vmatpush3.msra.mxu0 %v1707_v34 }
0x11fa   :  { %2427 = vmatprep.subr.mxu0 %v1706_v52 }
0x11fb   :  { %2428 = vmatpush3.msra.mxu0 %v1706_v52 }
0x11fc   :  { %2429 = vmatprep.subr.mxu0 %v1705_v53 }
0x11fd   :  { %2430 = vmatpush3.msra.mxu0 %v1705_v53 }
0x11fe   :  { %2432 = vmatmul.mubr.msk.f32.vlgmr.msra.gmra.mxu0 %vm899_vm14, %v3069_v29 }
0x11ff   :  { %2434 = vmatprep.mubr.msk.f32.mxu0 %vm899_vm14, %v3088_v44 }
0x1202   :  { %2435 = vmatmul.mubr.msk.f32.gmra.mxu0 %vm899_vm14, %v3113_v8 }
0x1203   :  { %2437 = vmatprep.mubr.msk.f32.mxu0 %vm899_vm14, %v1400_v39 }
0x1206   :  { %2438 = vmatmul.mubr.msk.f32.gmra.mxu0 %vm899_vm14, %v1500_v4 }
0x12b6   :  { %v1569_v54 = vpop.f32.mrf.mxu0 }
0x12b7   :  { %v1573_v55 = vadd.f32 %v1569_v54, %v887_v63 }
0x12b8   :  { %v2411_v56 = vpop.f32.mrf.mxu0 }
0x12b9   :  { %2556 = vtanh.f32 %v1573_v55  ;;  %v2073_v29 = vmul.f32 -1.442695, %v1573_v55 }
0x12bb   :  { %2558 = vpow2.f32 %v2073_v29 }
0x12be   :  { %v2433_v8 = vpop.f32.mrf.mxu0 }
0x12bf   :  { %v1790_v17 = vadd.f32 %v2433_v8, %v3185_v11 }
0x12c0   :  { %v1784_v9 = vpop.f32.mrf.mxu0 }
0x12c1   :  { %v1785_v12 = vadd.f32 %v3185_v11, %v1784_v9  ;;  %v1832_v36 = vmul.f32 0.01, %v1790_v17  ;;  %vm1824_vm0 = vcmp.gt.f32.partialorder %v1790_v17, 0.0 }
0x12c2   :  { %v2436_v10 = vpop.f32.mrf.mxu0 }
0x12c3   :  { %v1831_v15 = vmul.f32 0.01, %v1785_v12  ;;  %vm1823_vm15 = vcmp.gt.f32.partialorder %v1785_v12, 0.0  ;;  %v1800_v37 = vadd.f32 %v2436_v10, %v3185_v11  ;;  %v1840_v42 = vsel %vm1824_vm0, %v1790_v17, %v1832_v36 }
0x12c4   :  { %v1794_v14 = vpop.f32.mrf.mxu0 }
0x12c5   :  { %v1795_v24 = vadd.f32 %v3185_v11, %v1794_v14  ;;  %v1839_v30 = vsel %vm1823_vm15, %v1785_v12, %v1831_v15  ;;  %v1834_v18 = vmul.f32 0.01, %v1800_v37  ;;  %vm1826_vm2 = vcmp.gt.f32.partialorder %v1800_v37, 0.0 }
0x12c6   :  { %v2557_v57 = vpop.eup %2556  ;;  %v2439_v16 = vpop.f32.mrf.mxu0 }
0x12c7   :  { %1583 = vrot.lane.b32.xlu0 %v2557_v57, %s2617_s19  ;;  %v1833_v39 = vmul.f32 0.01, %v1795_v24  ;;  %vm1825_vm1 = vcmp.gt.f32.partialorder %v1795_v24, 0.0  ;;  %v1810_v43 = vadd.f32 %v2439_v16, %v3185_v11  ;;  %v1842_v25 = vsel %vm1826_vm2, %v1800_v37, %v1834_v18 }
0x12c8   :  { %v2559_v44 = vpop.eup %2558  ;;  %v1804_v33 = vpop.f32.mrf.mxu0 }
0x12c9   :  { %v1577_v58 = vadd.f32 1.0, %v2559_v44  ;;  %v1805_v40 = vadd.f32 %v3185_v11, %v1804_v33  ;;  %v1841_v46 = vsel %vm1825_vm1, %v1795_v24, %v1833_v39  ;;  %v1836_v20 = vmul.f32 0.01, %v1810_v43 }
0x12ca   :  { %vm1828_vm4 = vcmp.gt.f32.partialorder %v1810_v43, 0.0 }
0x12cb   :  { %2560 = vrcp.f32 %v1577_v58  ;;  %v1835_v45 = vmul.f32 0.01, %v1805_v40  ;;  %vm1827_vm3 = vcmp.gt.f32.partialorder %v1805_v40, 0.0  ;;  %v1844_v47 = vsel %vm1828_vm4, %v1810_v43, %v1836_v20 }
0x12cd   :  { %v1843_v21 = vsel %vm1827_vm3, %v1805_v40, %v1835_v45 }
0x12d8   :  { %v2561_v59 = vpop.eup %2560 }
0x12d9   :  { %v1581_v62 = vmul.f32 %v2561_v59, %v1491_v48 }
0x1339   :  { %v1584_v60 = vpop.permute.xlu0 %1583 }
0x133a   :  { %v1586_v61 = vmul.f32 %v2561_v59, %v1584_v60 }
0x133c   :  { %1588 = vrot.lane.b32.xlu1 %v1586_v61, %s2618_s3  ;;  %v2619_v61 = vmov 0  }
0x133d   :  { %2472 = vset.pattern.permute.xlu0 %v2619_v61 }
0x13ae   :  { %v1589_v0 = vpop.permute.xlu1 %1588 }
0x13af   :  { %v3174_v51 = vadd.f32 %v1589_v0, %v1581_v62 }
0x13b1   :  { %2562 = vtanh.f32 %v3174_v51 }
0x13be   :  { %v2563_v3 = vpop.eup %2562 }
0x13bf   :  { %1594 = vrot.lane.b32.xlu0 %v2563_v3, %s2617_s19  ;;  %v2620_v3 = vmov 1  }
0x13c0   :  { %2473 = vset.pattern.permute.xlu1 %v2620_v3 }
0x1431   :  { %v1595_v5 = vpop.permute.xlu0 %1594 }
0x1432   :  { %v1597_v7 = vmul.f32 %v2561_v59, %v1595_v5 }
0x1434   :  { %1599 = vrot.lane.b32.xlu1 %v1597_v7, %s2618_s3  ;;  %v2621_v7 = vmov 2  }
0x14a6   :  { %v1600_v19 = vpop.permute.xlu1 %1599 }
0x14a7   :  { %2421 = vmatmul.mubr.msk.f32.vlgmr.msra.gmra.mxu1 %vm899_vm14, %v1600_v19  ;;  %2440 = vmatprep.mubr.msk.f32.mxu0 %vm899_vm14, %v1600_v19 }
0x14a8   :  { %2444 = vmatpush3.msra.mxu1 %v1850_v1  ;;  %2451 = vmatprep.mubr.msk.f32.mxu1 %vm899_vm14, %v1839_v30 }
0x14a9   :  { %2445 = vmatprep.subr.mxu1 %v1849_v23 }
0x14aa   :  { %2446 = vmatpush3.msra.mxu1 %v1849_v23 }
0x14ab   :  { %2447 = vmatprep.subr.mxu1 %v1848_v35 }
0x14ac   :  { %2448 = vmatpush3.msra.mxu1 %v1848_v35 }
0x14ad   :  { %2449 = vmatprep.subr.mxu1 %v1847_v38 }
0x14ae   :  { %2450 = vmatpush3.msra.mxu1 %v1847_v38 }
0x14af   :  { %2452 = vmatmul.mubr.msk.f32.vlgmr.msra.gmra.mxu1 %vm899_vm14, %v1840_v42 }
0x14b0   :  { %2454 = vmatprep.mubr.msk.f32.mxu1 %vm899_vm14, %v1841_v46 }
0x14b3   :  { %2455 = vmatmul.mubr.msk.f32.gmra.mxu1 %vm899_vm14, %v1842_v25 }
0x14b4   :  { %2457 = vmatprep.mubr.msk.f32.mxu1 %vm899_vm14, %v1843_v21 }
0x14b7   :  { %2458 = vmatmul.mubr.msk.f32.gmra.mxu1 %vm899_vm14, %v1844_v47 }
0x1567   :  { %v1669_v22 = vpop.f32.mrf.mxu1 }
0x1568   :  { %v1673_v26 = vadd.f32 %v1669_v22, %v892_v28 }
0x1569   :  { %v2422_v48 = vpop.f32.mrf.mxu1 }
0x156a   :  { %2564 = vtanh.f32 %v1673_v26  ;;  %v2075_v57 = vmul.f32 -1.442695, %v1673_v26 }
0x156c   :  { %2566 = vpow2.f32 %v2075_v57 }
0x156f   :  { %v2453_v27 = vpop.f32.mrf.mxu1 }
0x1570   :  { %v1954_v31 = vadd.f32 %v2453_v27, %v3212_v49 }
0x1571   :  { %v1948_v32 = vpop.f32.mrf.mxu1 }
0x1572   :  { %1989 = vst.msk [vmem:[%s3304_s17 + $0x8] sm:$0xff] %vm1987_vm5, %v1954_v31  ;;  %v1949_v4 = vadd.f32 %v3212_v49, %v1948_v32 }
0x1573   :  { %v2456_v34 = vpop.f32.mrf.mxu1 }
0x1574   :  { %1988 = vst.msk [vmem:[%s3304_s17] sm:$0xff] %vm1987_vm5, %v1949_v4  ;;  %v1964_v50 = vadd.f32 %v2456_v34, %v3212_v49 }
0x1575   :  { %v1958_v13 = vpop.f32.mrf.mxu1 }
0x1576   :  { %1991 = vst.msk [vmem:[%s3304_s17 + $0x18] sm:$0xff] %vm1987_vm5, %v1964_v50  ;;  %v1959_v52 = vadd.f32 %v3212_v49, %v1958_v13 }
0x1577   :  { %v2565_v53 = vpop.eup %2564  ;;  %v2459_v63 = vpop.f32.mrf.mxu1 }
0x1578   :  { %1990 = vst.msk [vmem:[%s3304_s17 + $0x10] sm:$0xff] %vm1987_vm5, %v1959_v52  ;;  %v1974_v54 = vadd.f32 %v2459_v63, %v3212_v49  ;;  %1683 = vrot.lane.b32.xlu0 %v2565_v53, %s2617_s19 }
0x1579   :  { %v1968_v55 = vpop.f32.mrf.mxu1  ;;  %v2567_v29 = vpop.eup %2566 }
0x157a   :  { %1993 = vst.msk [vmem:[%s3304_s17 + $0x28] sm:$0xff] %vm1987_vm5, %v1974_v54  ;;  %v1969_v56 = vadd.f32 %v3212_v49, %v1968_v55  ;;  %v1677_v44 = vadd.f32 1.0, %v2567_v29 }
0x157c   :  { %1992 = vst.msk [vmem:[%s3304_s17 + $0x20] sm:$0xff] %vm1987_vm5, %v1969_v56  ;;  %2568 = vrcp.f32 %v1677_v44 }
0x1589   :  { %v2569_v58 = vpop.eup %2568 }
0x158a   :  { %v1681_v62 = vmul.f32 %v2569_v58, %v3174_v51  ;;  %v694_v51 = vshrl.u32 %v242_v41, 7  ;;  %v681_v41 = vld [vmem:[%s3296_s9] sm:$0xff]  ;;  %s2622_s9 = smov [#allocation3]  }
0x158b   :  { %v2047_v17 = vmul.f32 -1.442695, %v681_v41 }
0x158c   :  { %v695_v10 = vsub.s32 0, %v694_v51  ;;  %v711_v16 = vsub.s32 1, %v694_v51  ;;  %v727_v30 = vsub.s32 2, %v694_v51 }
0x158e   :  { %v696_v15 = vrot.slane %v2994_v6, %v695_v10  ;;  %v712_v23 = vrot.slane %v2994_v6, %v711_v16  ;;  %v728_v36 = vrot.slane %v2994_v6, %v727_v30 }
0x15ea   :  { %v1684_v59 = vpop.permute.xlu0 %1683 }
0x15eb   :  { %v1686_v60 = vmul.f32 %v2569_v58, %v1684_v59 }
0x15ed   :  { %1688 = vrot.lane.b32.xlu1 %v1686_v60, %s2618_s3 }
0x165f   :  { %v1689_v0 = vpop.permute.xlu1 %1688 }
0x1660   :  { %v1691_v1 = vadd.f32 %v1689_v0, %v1681_v62 }
0x1662   :  { %2570 = vtanh.f32 %v1691_v1 }
0x1663   :  { %2572 = vpow2.f32 %v2047_v17 }
0x166f   :  { %v2571_v5 = vpop.eup %2570 }
0x1670   :  { %1694 = vrot.lane.b32.xlu0 %v2571_v5, %s2617_s19  ;;  %v2573_v40 = vpop.eup %2572 }
0x1671   :  { %v685_v18 = vadd.f32 1.0, %v2573_v40 }
0x1674   :  { %690 = vperm.xlu0 %2472, %v2992_v2  }
0x1678   :  { %2475 = vset.pattern.permute.xlu0 %v2621_v7 }
0x16e2   :  { %v1695_v8 = vpop.permute.xlu0 %1694 }
0x16e3   :  { %v1697_v9 = vmul.f32 %v2569_v58, %v1695_v8 }
0x16e5   :  { %1699 = vrot.lane.b32.xlu1 %v1697_v9, %s2618_s3 }
0x16e9   :  { %706 = vperm.xlu1 %2473, %v2992_v2  }
0x16ed   :  { %2474 = vset.pattern.permute.xlu1 %v2621_v7 }
0x16ee   :  { %722 = vperm.xlu1 %2474, %v2992_v2  }
0x16ef   :  { %v691_v14 = vpop.permute.xlu0 %690 }
0x16f0   :  { %v697_v2 = vadd.f32 %v696_v15, %v691_v14 }
0x16f2   :  { %v2048_v19 = vmul.f32 -1.442695, %v697_v2 }
0x16f4   :  { %2574 = vpow2.f32 %v2048_v19 }
0x1701   :  { %v2575_v42 = vpop.eup %2574 }
0x1702   :  { %v701_v43 = vadd.f32 1.0, %v2575_v42 }
0x1757   :  { %v1700_v12 = vpop.permute.xlu1 %1699 }
0x1758   :  { %1702 = vst.msk [vmem:[%s3307_s20] sm:$0xff] %vm899_vm14, %v1700_v12  ;;  %2441 = vmatmul.mubr.msk.f32.gmra.mxu0 %vm899_vm14, %v1700_v12 }
0x1759   :  { %1704 = vst.msk [vmem:[%s3307_s20] sm:$0xff] %vm1703_vm6, %v1691_v1  ;;  %s2004_s20 = sshll.u32 %s2622_s9, 4  ;;  %s2005_s20 = int_to_ptr.vmem [resolvable:$true] %s2004_s20 }
0x175a   :  { %s2592_s6 = scalar_lea.vmem %s2005_s20, 128  ;;  %p2597_p1 = scmp.lt.s32.totalorder %s2005_s20, %s2005_s20 }
0x175b   :  { %p2593_p0 = scmp.ne.s32.totalorder %s2005_s20, %s2592_s6  ;;  %p2598_p2 = scmp.lt.s32.totalorder %s2592_s6, %s2592_s6 }
0x175d   :  { %p2599_p3 = por %p2598_p2, %p2597_p1 }
0x175f   :  { %p2600_p4 = pnand %p2599_p3, %p2593_p0 }
0x1764   :  { %v707_v24 = vpop.permute.xlu1 %706 }
0x1765   :  { %v713_v33 = vadd.f32 %v712_v23, %v707_v24 }
0x1767   :  { %v2049_v35 = vmul.f32 -1.442695, %v713_v33 }
0x1769   :  { %2576 = vpow2.f32 %v2049_v35  ;;  %v723_v37 = vpop.permute.xlu1 %722 }
0x176a   :  { %v729_v38 = vadd.f32 %v728_v36, %v723_v37 }
0x176c   :  { %v2050_v39 = vmul.f32 -1.442695, %v729_v38 }
0x176e   :  { %2578 = vpow2.f32 %v2050_v39 }
0x176f   :  { %2580 = vrcp.f32 %v685_v18 }
0x1770   :  { %2582 = vrcp.f32 %v701_v43 }
0x1776   :  { %v2577_v45 = vpop.eup %2576 }
0x1777   :  { %v717_v46 = vadd.f32 1.0, %v2577_v45 }
0x1779   :  { %2584 = vrcp.f32 %v717_v46 }
0x177b   :  { %v2579_v20 = vpop.eup %2578 }
0x177c   :  { %v733_v25 = vadd.f32 1.0, %v2579_v20  ;;  %v2581_v21 = vpop.eup %2580 }
0x177d   :  { %v2583_v47 = vpop.eup %2582 }
0x177e   :  { %2586 = vrcp.f32 %v733_v25  ;;  %v704_v28 = vadd.f32 %v2583_v47, %v2581_v21 }
0x1786   :  { %v2585_v6 = vpop.eup %2584 }
0x1787   :  { %v720_v22 = vadd.f32 %v2585_v6, %v704_v28 }
0x178b   :  { %v2587_v26 = vpop.eup %2586 }
0x178c   :  { %v736_v48 = vadd.f32 %v2587_v26, %v720_v22 }
0x178e   :  { %v738_v27 = vsel %vm737_vm7, %v736_v48, -inf }
0x178f   :  { %739 = vmax.xlane.f32.xlu0 %v738_v27 }
0x1818   :  { %v740_v31 = vpop.xlane.xlu0 %739  ;;  %v2442_v32 = vpop.f32.mrf.mxu0 }
0x1819   :  { %v741_v4 = vsub.f32 %v736_v48, %v740_v31  ;;  %v1820_v34 = vadd.f32 %v2442_v32, %v3185_v11 }
0x181a   :  { %v1814_v50 = vpop.f32.mrf.mxu0 }
0x181b   :  { %v742_v13 = vmul.f32 1.442695, %v741_v4  ;;  %v1815_v52 = vadd.f32 %v3185_v11, %v1814_v50  ;;  %v1838_v53 = vmul.f32 0.01, %v1820_v34  ;;  %vm1830_vm8 = vcmp.gt.f32.partialorder %v1820_v34, 0.0 }
0x181d   :  { %2588 = vpow2.f32 %v742_v13  ;;  %vm1829_vm9 = vcmp.gt.f32.partialorder %v1815_v52, 0.0  ;;  %v1837_v63 = vmul.f32 0.01, %v1815_v52  ;;  %v1846_v55 = vsel %vm1830_vm8, %v1820_v34, %v1838_v53 }
0x181f   :  { %v1845_v54 = vsel %vm1829_vm9, %v1815_v52, %v1837_v63 }
0x1820   :  { %2460 = vmatprep.mubr.msk.f32.mxu1 %vm899_vm14, %v1845_v54 }
0x1821   :  { %2461 = vmatmul.mubr.msk.f32.gmra.mxu1 %vm899_vm14, %v1846_v55 }
0x182a   :  { %v2589_v56 = vpop.eup %2588 }
0x182b   :  { %v744_v57 = vsel %vm737_vm7, %v2589_v56, 0.0 }
0x182c   :  { %745 = vadd.xlane.f32.xlu1 %v744_v57 }
0x18b5   :  { %v746_v29 = vpop.xlane.xlu1 %745 }
0x18b6   :  { %2590 = vrcp.f32 %v746_v29 }
0x18c3   :  { %v2591_v11 = vpop.eup %2590 }
0x18c4   :  { %v748_v44 = vmul.f32 %v2591_v11, %v2589_v56 }
0x18c6   :  { %749 = vst.msk [vmem:[#allocation3] sm:$0xff] %vm737_vm7, %v748_v44 }
0x18c7   :  { %2603 = shalt.err (!%p2600_p4)
}
0x18c8   :  { %2007 = dma.vmem_to_hbm [thread:$0]  %s2005_s20, 128, %s3305_s18, [#allocation4]  }
0x18e1   :  { %v2462_v58 = vpop.f32.mrf.mxu1 }
0x18e2   :  { %v1984_v59 = vadd.f32 %v2462_v58, %v3212_v49 }
0x18e3   :  { %v1978_v60 = vpop.f32.mrf.mxu1 }
0x18e4   :  { %1995 = vst.msk [vmem:[%s3304_s17 + $0x38] sm:$0xff] %vm1987_vm5, %v1984_v59  ;;  %v1979_v61 = vadd.f32 %v3212_v49, %v1978_v60 }
0x18e6   :  { %1994 = vst.msk [vmem:[%s3304_s17 + $0x30] sm:$0xff] %vm1987_vm5, %v1979_v61 }
0x18e7   :  { %2612 = dma.done.wait [#allocation4], 128  }
0x18e8   :  { %2613 = vsyncadd [#allocation4], 4294967168 }
0x18e9   :  { %2021 = vsyncpa [#allocation4], 1 }

</bundles_post_ra>
